<compile_context>
chip_gen: v7x
topology: tpu7x:2x2x1
jax: 0.10.0
libtpu: 0.0.40
codegen_flags: <defaults>
</compile_context>

<pallas_src>
import functools

import jax
import jax.numpy as jnp
from jax.experimental import pallas as pl
from jax.experimental.pallas import tpu as pltpu

EPS = 1e-5      # PyTorch BatchNorm2d default eps
LANE = 128      # TPU lane width; channel / class dims are padded to this


def _vmem():
    return pl.BlockSpec(memory_space=pltpu.MemorySpace.VMEM)


# ------------------------------- fused kernel -------------------------------

def _bn_relu(y, gamma, beta, *, relu):
    """Training-mode BatchNorm over rows (= N*H*W) per channel (= lane)."""
    mean = jnp.mean(y, axis=0, keepdims=True)
    var = jnp.mean((y - mean) ** 2, axis=0, keepdims=True)
    scale = gamma * jax.lax.rsqrt(var + EPS)          # (1, Cp)
    shift = beta - mean * scale
    y = y * scale + shift
    if relu:
        y = jnp.maximum(y, 0.0)
    return y


def _conv3x3(x, w_ref, mask_ref, *, Wp, M):
    """3x3 / stride 1 / pad 1 conv on an (M, Cp) slab, rows ordered (n, h, w).

    In-kernel im2col: for each of the 9 taps, rotate the rows by the spatial
    offset, zero the rows whose source falls outside the image (the conv zero
    padding), and accumulate a bf16 matmul with that tap's (Cp, Cp) weights.
    """
    x2 = jnp.concatenate([x, x], axis=0)              # (2M, Cp): cheap row rotation
    acc = jnp.zeros(x.shape, jnp.float32)
    t = 0
    for oy in (-1, 0, 1):
        for ox in (-1, 0, 1):
            s = (oy * Wp + ox) % M
            # shifted[r] = x[(r + oy*Wp + ox) % M], out-of-image rows masked to 0
            shifted = x2[s:s + M] * mask_ref[t]
            acc = acc + jnp.dot(shifted.astype(jnp.bfloat16), w_ref[t],
                                preferred_element_type=jnp.float32)
            t += 1
    return acc


def _resnet_kernel(p1_ref, w1_ref, g1_ref, b1_ref,
                   wb1_ref, gb1_ref, bb1_ref,
                   wb2_ref, gb2_ref, bb2_ref,
                   mask_ref, fcw_ref, fcb_ref,
                   out_ref, *, N, Hp, Wp):
    M2 = N * Hp * Wp
    HW = Hp * Wp

    # fc1 Conv2d(1->C, k3, s2, p1) as one matmul  +  fc2 BN  +  fc3 ReLU
    y = jnp.dot(p1_ref[...], w1_ref[...], preferred_element_type=jnp.float32)
    y = _bn_relu(y, g1_ref[...], b1_ref[...], relu=True)

    # fc4 MaxPool2d(2): rows are pool-window-major -> max of 4 contiguous slabs
    y = jnp.maximum(jnp.maximum(y[0 * M2:1 * M2], y[1 * M2:2 * M2]),
                    jnp.maximum(y[2 * M2:3 * M2], y[3 * M2:4 * M2]))
    residual = y

    # fc5 Block: conv + BN + ReLU, conv + BN, add residual, ReLU
    z = _conv3x3(y, wb1_ref, mask_ref, Wp=Wp, M=M2)
    z = _bn_relu(z, gb1_ref[...], bb1_ref[...], relu=True)
    z = _conv3x3(z, wb2_ref, mask_ref, Wp=Wp, M=M2)
    z = _bn_relu(z, gb2_ref[...], bb2_ref[...], relu=False)
    z = jnp.maximum(z + residual, 0.0)

    # fc6 AdaptiveAvgPool2d(1)  +  fc7 Linear (output lanes padded to 128)
    pooled = jnp.concatenate(
        [jnp.mean(z[n * HW:(n + 1) * HW], axis=0, keepdims=True)
         for n in range(N)], axis=0)                  # (N, Cp)
    out_ref[...] = (jnp.dot(pooled, fcw_ref[...],
                            preferred_element_type=jnp.float32) + fcb_ref[...])


# ------------------------- wrapper / parameter packing -----------------------

def _pad_cols(v, width):
    v = v.reshape(1, -1).astype(jnp.float32)
    return jnp.pad(v, ((0, 0), (0, width - v.shape[1])))


def _block_conv_taps(w, cp):
    """PyTorch (Cout, Cin, 3, 3) -> (9, Cin_pad, Cout_pad) bf16, tap = kh*3+kw."""
    cout, cin, _, _ = w.shape
    t = jnp.transpose(w, (2, 3, 1, 0)).reshape(9, cin, cout)
    return jnp.pad(t, ((0, 0), (0, cp - cin), (0, cp - cout))).astype(jnp.bfloat16)


def _conv1_matrix(w, kp, cp):
    """PyTorch (Cout, 1, 3, 3) -> (kp, Cout_pad) bf16 matching the patch columns."""
    cout = w.shape[0]
    m = jnp.transpose(w, (2, 3, 1, 0)).reshape(9, cout)
    return jnp.pad(m, ((0, kp - 9), (0, cp - cout))).astype(jnp.bfloat16)


def resnet_forward(x_nchw, params):
    """Equivalent of ResNet.forward (minus the debug prints). Output: (N, 10)."""
    N, cin, H, W = x_nchw.shape
    assert cin == 1
    C = params["conv1_w"].shape[0]
    num_classes = params["fc_w"].shape[0]
    Cp = ((C + LANE - 1) // LANE) * LANE
    Kp = LANE                                          # conv1 contraction dim (9 -> 128)

    Ho = (H + 2 - 3) // 2 + 1
    Wo = (W + 2 - 3) // 2 + 1
    assert Ho % 2 == 0 and Wo % 2 == 0                 # see TODO(synk) above
    Hp, Wp = Ho // 2, Wo // 2
    M2 = N * Hp * Wp

    # conv1 patches (Cin=1 -> only 9 scalar taps per output position), rows
    # reordered pool-window-major so MaxPool2d(2) is 4 contiguous row slabs.
    x2 = x_nchw[:, 0].astype(jnp.float32)              # (N, H, W)
    xp = jnp.pad(x2, ((0, 0), (1, 1), (1, 1)))
    cols = [xp[:, kh:kh + 2 * Ho:2, kw:kw + 2 * Wo:2]
            for kh in range(3) for kw in range(3)]
    p1 = jnp.stack(cols, axis=-1)                      # (N, Ho, Wo, 9)
    p1 = p1.reshape(N, Hp, 2, Wp, 2, 9).transpose(2, 4, 0, 1, 3, 5)
    p1 = p1.reshape(4 * M2, 9)
    p1 = jnp.pad(p1, ((0, 0), (0, Kp - 9))).astype(jnp.bfloat16)

    # per-tap zero-padding masks for the in-kernel 3x3 convs of the Block
    rows = jnp.arange(M2)
    wp_i = rows % Wp
    hp_i = (rows // Wp) % Hp
    masks = []
    for kh in range(3):
        for kw in range(3):
            oy, ox = kh - 1, kw - 1
            valid = ((hp_i + oy >= 0) & (hp_i + oy < Hp) &
                     (wp_i + ox >= 0) & (wp_i + ox < Wp))
            masks.append(valid.astype(jnp.float32))
    masks = jnp.stack(masks, axis=0).reshape(9, M2, 1)

    # packed / padded parameters (zero-padding keeps padded channels exactly 0)
    w1 = _conv1_matrix(params["conv1_w"], Kp, Cp)
    wb1 = _block_conv_taps(params["blk_conv1_w"], Cp)
    wb2 = _block_conv_taps(params["blk_conv2_w"], Cp)
    g1, b1 = _pad_cols(params["bn1_g"], Cp), _pad_cols(params["bn1_b"], Cp)
    gb1, bb1 = _pad_cols(params["blk_bn1_g"], Cp), _pad_cols(params["blk_bn1_b"], Cp)
    gb2, bb2 = _pad_cols(params["blk_bn2_g"], Cp), _pad_cols(params["blk_bn2_b"], Cp)
    fcw = jnp.pad(params["fc_w"].T.astype(jnp.float32),
                  ((0, Cp - C), (0, LANE - num_classes)))
    fcb = _pad_cols(params["fc_b"], LANE)

    kern = functools.partial(_resnet_kernel, N=N, Hp=Hp, Wp=Wp)
    out = pl.pallas_call(
        kern,
        out_shape=jax.ShapeDtypeStruct((N, LANE), jnp.float32),
        in_specs=[_vmem()] * 13,
        out_specs=_vmem(),
        compiler_params=pltpu.CompilerParams(vmem_limit_bytes=32 * 1024 * 1024),
    )(p1, w1, g1, b1, wb1, gb1, bb1, wb2, gb2, bb2, masks, fcw, fcb)
    return out[:, :num_classes]


# ----------------------- reference (pure JAX, NCHW, f32) ---------------------

def reference_forward(x, params):
    def conv(x, w, stride):
        return jax.lax.conv_general_dilated(
            x, w, window_strides=(stride, stride), padding=((1, 1), (1, 1)),
            dimension_numbers=("NCHW", "OIHW", "NCHW"))

    def bn(x, g, b):
        mean = jnp.mean(x, axis=(0, 2, 3), keepdims=True)
        var = jnp.mean((x - mean) ** 2, axis=(0, 2, 3), keepdims=True)
        return ((x - mean) * jax.lax.rsqrt(var + EPS)
                * g.reshape(1, -1, 1, 1) + b.reshape(1, -1, 1, 1))

    y = jnp.maximum(bn(conv(x, params["conv1_w"], 2),
                       params["bn1_g"], params["bn1_b"]), 0.0)
    N, C, H, W = y.shape
    y = y.reshape(N, C, H // 2, 2, W // 2, 2).max(axis=(3, 5))
    residual = y
    z = jnp.maximum(bn(conv(y, params["blk_conv1_w"], 1),
                       params["blk_bn1_g"], params["blk_bn1_b"]), 0.0)
    z = bn(conv(z, params["blk_conv2_w"], 1),
           params["blk_bn2_g"], params["blk_bn2_b"])
    z = jnp.maximum(z + residual, 0.0)
    pooled = jnp.mean(z, axis=(2, 3))
    return pooled @ params["fc_w"].T + params["fc_b"]


# ------------------------------ parameter init -------------------------------

def init_params(key, num_channels, num_classes=10):
    C = num_channels
    k1, k2, k3, k4, k5 = jax.random.split(key, 5)

    def he(k, shape, fan_in):
        return jax.random.normal(k, shape, jnp.float32) * jnp.sqrt(2.0 / fan_in)

    return {
        "conv1_w": he(k1, (C, 1, 3, 3), 1 * 9),
        "bn1_g": jnp.ones((1, C), jnp.float32),
        "bn1_b": jnp.zeros((1, C), jnp.float32),
        "blk_conv1_w": he(k2, (C, C, 3, 3), C * 9),
        "blk_bn1_g": jnp.ones((1, C), jnp.float32),
        "blk_bn1_b": jnp.zeros((1, C), jnp.float32),
        "blk_conv2_w": he(k3, (C, C, 3, 3), C * 9),
        "blk_bn2_g": jnp.ones((1, C), jnp.float32),
        "blk_bn2_b": jnp.zeros((1, C), jnp.float32),
        "fc_w": he(k4, (num_classes, C), C),
        "fc_b": jax.random.normal(k5, (num_classes,), jnp.float32) * 0.01,
    }


# ----------------------------------- main ------------------------------------

if __name__ == "__main__":
    key = jax.random.PRNGKey(0)
    kx, kp = jax.random.split(key)

    N, num_channels, H, W = 2, 8, 16, 16
    x = jax.random.normal(kx, (N, 1, H, W), jnp.float32)
    params = init_params(kp, num_channels)

    out = jax.jit(resnet_forward)(x, params)
    out = jax.block_until_ready(out)
    assert out.shape == (N, 10), out.shape

    ref = reference_forward(x, params)
    max_err = jnp.max(jnp.abs(out - ref))
    # bf16 matmul operands (f32 accumulation) -> tolerance loosened vs f32 ref.
    if not jnp.allclose(out, ref, atol=1e-1, rtol=5e-2):
        raise AssertionError(
            f"Pallas output mismatch vs reference: max abs err {max_err}")

    print("KERNEL_OK")
</pallas_src>

<mosaic_0001>
module attributes {stable_mosaic.version = 11 : i64} {
  func.func @_resnet_kernel(%arg0: memref<128x128xbf16, #tpu.memory_space<vmem>>, %arg1: memref<128x128xbf16, #tpu.memory_space<vmem>>, %arg2: memref<1x128xf32, #tpu.memory_space<vmem>>, %arg3: memref<1x128xf32, #tpu.memory_space<vmem>>, %arg4: memref<9x128x128xbf16, #tpu.memory_space<vmem>>, %arg5: memref<1x128xf32, #tpu.memory_space<vmem>>, %arg6: memref<1x128xf32, #tpu.memory_space<vmem>>, %arg7: memref<9x128x128xbf16, #tpu.memory_space<vmem>>, %arg8: memref<1x128xf32, #tpu.memory_space<vmem>>, %arg9: memref<1x128xf32, #tpu.memory_space<vmem>>, %arg10: memref<9x32x1xf32, #tpu.memory_space<vmem>>, %arg11: memref<128x128xf32, #tpu.memory_space<vmem>>, %arg12: memref<1x128xf32, #tpu.memory_space<vmem>>, %arg13: memref<2x128xf32, #tpu.memory_space<vmem>>) attributes {dimension_semantics = [], scalar_prefetch = 0 : i64, scratch_operands = 0 : i64, tpu.core_type = #tpu.core_type<tc>} {
    %c0 = arith.constant 0 : index
    %c0_0 = arith.constant 0 : index
    %0 = vector.load %arg0[%c0, %c0_0] : memref<128x128xbf16, #tpu.memory_space<vmem>>, vector<128x128xbf16>
    %c0_1 = arith.constant 0 : index
    %c0_2 = arith.constant 0 : index
    %1 = vector.load %arg1[%c0_1, %c0_2] : memref<128x128xbf16, #tpu.memory_space<vmem>>, vector<128x128xbf16>
    %cst = arith.constant dense<0.000000e+00> : vector<128x128xf32>
    %2 = tpu.matmul %0, %1, %cst {dimension_numbers = #tpu.dot_dimension_numbers<[1], [0], [0], [1], [0, 0, 1, 1], [], []>} : vector<128x128xbf16>, vector<128x128xbf16>, vector<128x128xf32> -> vector<128x128xf32>
    %c0_3 = arith.constant 0 : index
    %c0_4 = arith.constant 0 : index
    %3 = vector.load %arg2[%c0_3, %c0_4] : memref<1x128xf32, #tpu.memory_space<vmem>>, vector<1x128xf32>
    %c0_5 = arith.constant 0 : index
    %c0_6 = arith.constant 0 : index
    %4 = vector.load %arg3[%c0_5, %c0_6] : memref<1x128xf32, #tpu.memory_space<vmem>>, vector<1x128xf32>
    %cst_7 = arith.constant dense<0.000000e+00> : vector<128xf32>
    %5 = vector.multi_reduction <add>, %2, %cst_7 [0] : vector<128x128xf32> to vector<128xf32>
    %6 = vector.shape_cast %5 : vector<128xf32> to vector<1x128xf32>
    %cst_8 = arith.constant 1.280000e+02 : f32
    %7 = vector.broadcast %cst_8 : f32 to vector<1x128xf32>
    %8 = arith.divf %6, %7 : vector<1x128xf32>
    %9 = vector.broadcast %8 : vector<1x128xf32> to vector<128x128xf32>
    %10 = arith.subf %2, %9 : vector<128x128xf32>
    %11 = arith.mulf %10, %10 : vector<128x128xf32>
    %cst_9 = arith.constant dense<0.000000e+00> : vector<128xf32>
    %12 = vector.multi_reduction <add>, %11, %cst_9 [0] : vector<128x128xf32> to vector<128xf32>
    %13 = vector.shape_cast %12 : vector<128xf32> to vector<1x128xf32>
    %cst_10 = arith.constant 1.280000e+02 : f32
    %14 = vector.broadcast %cst_10 : f32 to vector<1x128xf32>
    %15 = arith.divf %13, %14 : vector<1x128xf32>
    %cst_11 = arith.constant 9.99999974E-6 : f32
    %16 = vector.broadcast %cst_11 : f32 to vector<1x128xf32>
    %17 = arith.addf %15, %16 : vector<1x128xf32>
    %18 = math.rsqrt %17 : vector<1x128xf32>
    %19 = arith.mulf %3, %18 : vector<1x128xf32>
    %20 = arith.mulf %8, %19 : vector<1x128xf32>
    %21 = arith.subf %4, %20 : vector<1x128xf32>
    %22 = vector.broadcast %19 : vector<1x128xf32> to vector<128x128xf32>
    %23 = arith.mulf %2, %22 : vector<128x128xf32>
    %24 = vector.broadcast %21 : vector<1x128xf32> to vector<128x128xf32>
    %25 = arith.addf %23, %24 : vector<128x128xf32>
    %cst_12 = arith.constant 0.000000e+00 : f32
    %26 = vector.broadcast %cst_12 : f32 to vector<128x128xf32>
    %27 = arith.maximumf %25, %26 : vector<128x128xf32>
    %28 = vector.extract_strided_slice %27 {offsets = [0, 0], sizes = [32, 128], strides = [1, 1]} : vector<128x128xf32> to vector<32x128xf32>
    %29 = vector.extract_strided_slice %27 {offsets = [32, 0], sizes = [32, 128], strides = [1, 1]} : vector<128x128xf32> to vector<32x128xf32>
    %30 = arith.maximumf %28, %29 : vector<32x128xf32>
    %31 = vector.extract_strided_slice %27 {offsets = [64, 0], sizes = [32, 128], strides = [1, 1]} : vector<128x128xf32> to vector<32x128xf32>
    %32 = vector.extract_strided_slice %27 {offsets = [96, 0], sizes = [32, 128], strides = [1, 1]} : vector<128x128xf32> to vector<32x128xf32>
    %33 = arith.maximumf %31, %32 : vector<32x128xf32>
    %34 = arith.maximumf %30, %33 : vector<32x128xf32>
    %35 = tpu.concatenate %34, %34 in 0 : vector<32x128xf32>, vector<32x128xf32> -> vector<64x128xf32>
    %cst_13 = arith.constant 0.000000e+00 : f32
    %36 = vector.broadcast %cst_13 : f32 to vector<32x128xf32>
    %37 = vector.extract_strided_slice %35 {offsets = [27, 0], sizes = [32, 128], strides = [1, 1]} : vector<64x128xf32> to vector<32x128xf32>
    %c0_14 = arith.constant 0 : index
    %c0_15 = arith.constant 0 : index
    %c0_16 = arith.constant 0 : index
    %38 = vector.load %arg10[%c0_14, %c0_15, %c0_16] : memref<9x32x1xf32, #tpu.memory_space<vmem>>, vector<1x32x1xf32>
    %39 = vector.shape_cast %38 : vector<1x32x1xf32> to vector<32x1xf32>
    %40 = vector.broadcast %39 : vector<32x1xf32> to vector<32x128xf32>
    %41 = arith.mulf %37, %40 : vector<32x128xf32>
    %42 = arith.truncf %41 : vector<32x128xf32> to vector<32x128xbf16>
    %c0_17 = arith.constant 0 : index
    %c0_18 = arith.constant 0 : index
    %c0_19 = arith.constant 0 : index
    %43 = vector.load %arg4[%c0_17, %c0_18, %c0_19] : memref<9x128x128xbf16, #tpu.memory_space<vmem>>, vector<1x128x128xbf16>
    %44 = vector.shape_cast %43 : vector<1x128x128xbf16> to vector<128x128xbf16>
    %cst_20 = arith.constant dense<0.000000e+00> : vector<32x128xf32>
    %45 = tpu.matmul %42, %44, %cst_20 {dimension_numbers = #tpu.dot_dimension_numbers<[1], [0], [0], [1], [0, 0, 1, 1], [], []>} : vector<32x128xbf16>, vector<128x128xbf16>, vector<32x128xf32> -> vector<32x128xf32>
    %46 = arith.addf %36, %45 : vector<32x128xf32>
    %47 = vector.extract_strided_slice %35 {offsets = [28, 0], sizes = [32, 128], strides = [1, 1]} : vector<64x128xf32> to vector<32x128xf32>
    %c1 = arith.constant 1 : index
    %c0_21 = arith.constant 0 : index
    %c0_22 = arith.constant 0 : index
    %48 = vector.load %arg10[%c1, %c0_21, %c0_22] : memref<9x32x1xf32, #tpu.memory_space<vmem>>, vector<1x32x1xf32>
    %49 = vector.shape_cast %48 : vector<1x32x1xf32> to vector<32x1xf32>
    %50 = vector.broadcast %49 : vector<32x1xf32> to vector<32x128xf32>
    %51 = arith.mulf %47, %50 : vector<32x128xf32>
    %52 = arith.truncf %51 : vector<32x128xf32> to vector<32x128xbf16>
    %c1_23 = arith.constant 1 : index
    %c0_24 = arith.constant 0 : index
    %c0_25 = arith.constant 0 : index
    %53 = vector.load %arg4[%c1_23, %c0_24, %c0_25] : memref<9x128x128xbf16, #tpu.memory_space<vmem>>, vector<1x128x128xbf16>
    %54 = vector.shape_cast %53 : vector<1x128x128xbf16> to vector<128x128xbf16>
    %cst_26 = arith.constant dense<0.000000e+00> : vector<32x128xf32>
    %55 = tpu.matmul %52, %54, %cst_26 {dimension_numbers = #tpu.dot_dimension_numbers<[1], [0], [0], [1], [0, 0, 1, 1], [], []>} : vector<32x128xbf16>, vector<128x128xbf16>, vector<32x128xf32> -> vector<32x128xf32>
    %56 = arith.addf %46, %55 : vector<32x128xf32>
    %57 = vector.extract_strided_slice %35 {offsets = [29, 0], sizes = [32, 128], strides = [1, 1]} : vector<64x128xf32> to vector<32x128xf32>
    %c2 = arith.constant 2 : index
    %c0_27 = arith.constant 0 : index
    %c0_28 = arith.constant 0 : index
    %58 = vector.load %arg10[%c2, %c0_27, %c0_28] : memref<9x32x1xf32, #tpu.memory_space<vmem>>, vector<1x32x1xf32>
    %59 = vector.shape_cast %58 : vector<1x32x1xf32> to vector<32x1xf32>
    %60 = vector.broadcast %59 : vector<32x1xf32> to vector<32x128xf32>
    %61 = arith.mulf %57, %60 : vector<32x128xf32>
    %62 = arith.truncf %61 : vector<32x128xf32> to vector<32x128xbf16>
    %c2_29 = arith.constant 2 : index
    %c0_30 = arith.constant 0 : index
    %c0_31 = arith.constant 0 : index
    %63 = vector.load %arg4[%c2_29, %c0_30, %c0_31] : memref<9x128x128xbf16, #tpu.memory_space<vmem>>, vector<1x128x128xbf16>
    %64 = vector.shape_cast %63 : vector<1x128x128xbf16> to vector<128x128xbf16>
    %cst_32 = arith.constant dense<0.000000e+00> : vector<32x128xf32>
    %65 = tpu.matmul %62, %64, %cst_32 {dimension_numbers = #tpu.dot_dimension_numbers<[1], [0], [0], [1], [0, 0, 1, 1], [], []>} : vector<32x128xbf16>, vector<128x128xbf16>, vector<32x128xf32> -> vector<32x128xf32>
    %66 = arith.addf %56, %65 : vector<32x128xf32>
    %67 = vector.extract_strided_slice %35 {offsets = [31, 0], sizes = [32, 128], strides = [1, 1]} : vector<64x128xf32> to vector<32x128xf32>
    %c3 = arith.constant 3 : index
    %c0_33 = arith.constant 0 : index
    %c0_34 = arith.constant 0 : index
    %68 = vector.load %arg10[%c3, %c0_33, %c0_34] : memref<9x32x1xf32, #tpu.memory_space<vmem>>, vector<1x32x1xf32>
    %69 = vector.shape_cast %68 : vector<1x32x1xf32> to vector<32x1xf32>
    %70 = vector.broadcast %69 : vector<32x1xf32> to vector<32x128xf32>
    %71 = arith.mulf %67, %70 : vector<32x128xf32>
    %72 = arith.truncf %71 : vector<32x128xf32> to vector<32x128xbf16>
    %c3_35 = arith.constant 3 : index
    %c0_36 = arith.constant 0 : index
    %c0_37 = arith.constant 0 : index
    %73 = vector.load %arg4[%c3_35, %c0_36, %c0_37] : memref<9x128x128xbf16, #tpu.memory_space<vmem>>, vector<1x128x128xbf16>
    %74 = vector.shape_cast %73 : vector<1x128x128xbf16> to vector<128x128xbf16>
    %cst_38 = arith.constant dense<0.000000e+00> : vector<32x128xf32>
    %75 = tpu.matmul %72, %74, %cst_38 {dimension_numbers = #tpu.dot_dimension_numbers<[1], [0], [0], [1], [0, 0, 1, 1], [], []>} : vector<32x128xbf16>, vector<128x128xbf16>, vector<32x128xf32> -> vector<32x128xf32>
    %76 = arith.addf %66, %75 : vector<32x128xf32>
    %77 = vector.extract_strided_slice %35 {offsets = [0, 0], sizes = [32, 128], strides = [1, 1]} : vector<64x128xf32> to vector<32x128xf32>
    %c4 = arith.constant 4 : index
    %c0_39 = arith.constant 0 : index
    %c0_40 = arith.constant 0 : index
    %78 = vector.load %arg10[%c4, %c0_39, %c0_40] : memref<9x32x1xf32, #tpu.memory_space<vmem>>, vector<1x32x1xf32>
    %79 = vector.shape_cast %78 : vector<1x32x1xf32> to vector<32x1xf32>
    %80 = vector.broadcast %79 : vector<32x1xf32> to vector<32x128xf32>
    %81 = arith.mulf %77, %80 : vector<32x128xf32>
    %82 = arith.truncf %81 : vector<32x128xf32> to vector<32x128xbf16>
    %c4_41 = arith.constant 4 : index
    %c0_42 = arith.constant 0 : index
    %c0_43 = arith.constant 0 : index
    %83 = vector.load %arg4[%c4_41, %c0_42, %c0_43] : memref<9x128x128xbf16, #tpu.memory_space<vmem>>, vector<1x128x128xbf16>
    %84 = vector.shape_cast %83 : vector<1x128x128xbf16> to vector<128x128xbf16>
    %cst_44 = arith.constant dense<0.000000e+00> : vector<32x128xf32>
    %85 = tpu.matmul %82, %84, %cst_44 {dimension_numbers = #tpu.dot_dimension_numbers<[1], [0], [0], [1], [0, 0, 1, 1], [], []>} : vector<32x128xbf16>, vector<128x128xbf16>, vector<32x128xf32> -> vector<32x128xf32>
    %86 = arith.addf %76, %85 : vector<32x128xf32>
    %87 = vector.extract_strided_slice %35 {offsets = [1, 0], sizes = [32, 128], strides = [1, 1]} : vector<64x128xf32> to vector<32x128xf32>
    %c5 = arith.constant 5 : index
    %c0_45 = arith.constant 0 : index
    %c0_46 = arith.constant 0 : index
    %88 = vector.load %arg10[%c5, %c0_45, %c0_46] : memref<9x32x1xf32, #tpu.memory_space<vmem>>, vector<1x32x1xf32>
    %89 = vector.shape_cast %88 : vector<1x32x1xf32> to vector<32x1xf32>
    %90 = vector.broadcast %89 : vector<32x1xf32> to vector<32x128xf32>
    %91 = arith.mulf %87, %90 : vector<32x128xf32>
    %92 = arith.truncf %91 : vector<32x128xf32> to vector<32x128xbf16>
    %c5_47 = arith.constant 5 : index
    %c0_48 = arith.constant 0 : index
    %c0_49 = arith.constant 0 : index
    %93 = vector.load %arg4[%c5_47, %c0_48, %c0_49] : memref<9x128x128xbf16, #tpu.memory_space<vmem>>, vector<1x128x128xbf16>
    %94 = vector.shape_cast %93 : vector<1x128x128xbf16> to vector<128x128xbf16>
    %cst_50 = arith.constant dense<0.000000e+00> : vector<32x128xf32>
    %95 = tpu.matmul %92, %94, %cst_50 {dimension_numbers = #tpu.dot_dimension_numbers<[1], [0], [0], [1], [0, 0, 1, 1], [], []>} : vector<32x128xbf16>, vector<128x128xbf16>, vector<32x128xf32> -> vector<32x128xf32>
    %96 = arith.addf %86, %95 : vector<32x128xf32>
    %97 = vector.extract_strided_slice %35 {offsets = [3, 0], sizes = [32, 128], strides = [1, 1]} : vector<64x128xf32> to vector<32x128xf32>
    %c6 = arith.constant 6 : index
    %c0_51 = arith.constant 0 : index
    %c0_52 = arith.constant 0 : index
    %98 = vector.load %arg10[%c6, %c0_51, %c0_52] : memref<9x32x1xf32, #tpu.memory_space<vmem>>, vector<1x32x1xf32>
    %99 = vector.shape_cast %98 : vector<1x32x1xf32> to vector<32x1xf32>
    %100 = vector.broadcast %99 : vector<32x1xf32> to vector<32x128xf32>
    %101 = arith.mulf %97, %100 : vector<32x128xf32>
    %102 = arith.truncf %101 : vector<32x128xf32> to vector<32x128xbf16>
    %c6_53 = arith.constant 6 : index
    %c0_54 = arith.constant 0 : index
    %c0_55 = arith.constant 0 : index
    %103 = vector.load %arg4[%c6_53, %c0_54, %c0_55] : memref<9x128x128xbf16, #tpu.memory_space<vmem>>, vector<1x128x128xbf16>
    %104 = vector.shape_cast %103 : vector<1x128x128xbf16> to vector<128x128xbf16>
    %cst_56 = arith.constant dense<0.000000e+00> : vector<32x128xf32>
    %105 = tpu.matmul %102, %104, %cst_56 {dimension_numbers = #tpu.dot_dimension_numbers<[1], [0], [0], [1], [0, 0, 1, 1], [], []>} : vector<32x128xbf16>, vector<128x128xbf16>, vector<32x128xf32> -> vector<32x128xf32>
    %106 = arith.addf %96, %105 : vector<32x128xf32>
    %107 = vector.extract_strided_slice %35 {offsets = [4, 0], sizes = [32, 128], strides = [1, 1]} : vector<64x128xf32> to vector<32x128xf32>
    %c7 = arith.constant 7 : index
    %c0_57 = arith.constant 0 : index
    %c0_58 = arith.constant 0 : index
    %108 = vector.load %arg10[%c7, %c0_57, %c0_58] : memref<9x32x1xf32, #tpu.memory_space<vmem>>, vector<1x32x1xf32>
    %109 = vector.shape_cast %108 : vector<1x32x1xf32> to vector<32x1xf32>
    %110 = vector.broadcast %109 : vector<32x1xf32> to vector<32x128xf32>
    %111 = arith.mulf %107, %110 : vector<32x128xf32>
    %112 = arith.truncf %111 : vector<32x128xf32> to vector<32x128xbf16>
    %c7_59 = arith.constant 7 : index
    %c0_60 = arith.constant 0 : index
    %c0_61 = arith.constant 0 : index
    %113 = vector.load %arg4[%c7_59, %c0_60, %c0_61] : memref<9x128x128xbf16, #tpu.memory_space<vmem>>, vector<1x128x128xbf16>
    %114 = vector.shape_cast %113 : vector<1x128x128xbf16> to vector<128x128xbf16>
    %cst_62 = arith.constant dense<0.000000e+00> : vector<32x128xf32>
    %115 = tpu.matmul %112, %114, %cst_62 {dimension_numbers = #tpu.dot_dimension_numbers<[1], [0], [0], [1], [0, 0, 1, 1], [], []>} : vector<32x128xbf16>, vector<128x128xbf16>, vector<32x128xf32> -> vector<32x128xf32>
    %116 = arith.addf %106, %115 : vector<32x128xf32>
    %117 = vector.extract_strided_slice %35 {offsets = [5, 0], sizes = [32, 128], strides = [1, 1]} : vector<64x128xf32> to vector<32x128xf32>
    %c8 = arith.constant 8 : index
    %c0_63 = arith.constant 0 : index
    %c0_64 = arith.constant 0 : index
    %118 = vector.load %arg10[%c8, %c0_63, %c0_64] : memref<9x32x1xf32, #tpu.memory_space<vmem>>, vector<1x32x1xf32>
    %119 = vector.shape_cast %118 : vector<1x32x1xf32> to vector<32x1xf32>
    %120 = vector.broadcast %119 : vector<32x1xf32> to vector<32x128xf32>
    %121 = arith.mulf %117, %120 : vector<32x128xf32>
    %122 = arith.truncf %121 : vector<32x128xf32> to vector<32x128xbf16>
    %c8_65 = arith.constant 8 : index
    %c0_66 = arith.constant 0 : index
    %c0_67 = arith.constant 0 : index
    %123 = vector.load %arg4[%c8_65, %c0_66, %c0_67] : memref<9x128x128xbf16, #tpu.memory_space<vmem>>, vector<1x128x128xbf16>
    %124 = vector.shape_cast %123 : vector<1x128x128xbf16> to vector<128x128xbf16>
    %cst_68 = arith.constant dense<0.000000e+00> : vector<32x128xf32>
    %125 = tpu.matmul %122, %124, %cst_68 {dimension_numbers = #tpu.dot_dimension_numbers<[1], [0], [0], [1], [0, 0, 1, 1], [], []>} : vector<32x128xbf16>, vector<128x128xbf16>, vector<32x128xf32> -> vector<32x128xf32>
    %126 = arith.addf %116, %125 : vector<32x128xf32>
    %c0_69 = arith.constant 0 : index
    %c0_70 = arith.constant 0 : index
    %127 = vector.load %arg5[%c0_69, %c0_70] : memref<1x128xf32, #tpu.memory_space<vmem>>, vector<1x128xf32>
    %c0_71 = arith.constant 0 : index
    %c0_72 = arith.constant 0 : index
    %128 = vector.load %arg6[%c0_71, %c0_72] : memref<1x128xf32, #tpu.memory_space<vmem>>, vector<1x128xf32>
    %cst_73 = arith.constant dense<0.000000e+00> : vector<128xf32>
    %129 = vector.multi_reduction <add>, %126, %cst_73 [0] : vector<32x128xf32> to vector<128xf32>
    %130 = vector.shape_cast %129 : vector<128xf32> to vector<1x128xf32>
    %cst_74 = arith.constant 3.200000e+01 : f32
    %131 = vector.broadcast %cst_74 : f32 to vector<1x128xf32>
    %132 = arith.divf %130, %131 : vector<1x128xf32>
    %133 = vector.broadcast %132 : vector<1x128xf32> to vector<32x128xf32>
    %134 = arith.subf %126, %133 : vector<32x128xf32>
    %135 = arith.mulf %134, %134 : vector<32x128xf32>
    %cst_75 = arith.constant dense<0.000000e+00> : vector<128xf32>
    %136 = vector.multi_reduction <add>, %135, %cst_75 [0] : vector<32x128xf32> to vector<128xf32>
    %137 = vector.shape_cast %136 : vector<128xf32> to vector<1x128xf32>
    %cst_76 = arith.constant 3.200000e+01 : f32
    %138 = vector.broadcast %cst_76 : f32 to vector<1x128xf32>
    %139 = arith.divf %137, %138 : vector<1x128xf32>
    %cst_77 = arith.constant 9.99999974E-6 : f32
    %140 = vector.broadcast %cst_77 : f32 to vector<1x128xf32>
    %141 = arith.addf %139, %140 : vector<1x128xf32>
    %142 = math.rsqrt %141 : vector<1x128xf32>
    %143 = arith.mulf %127, %142 : vector<1x128xf32>
    %144 = arith.mulf %132, %143 : vector<1x128xf32>
    %145 = arith.subf %128, %144 : vector<1x128xf32>
    %146 = vector.broadcast %143 : vector<1x128xf32> to vector<32x128xf32>
    %147 = arith.mulf %126, %146 : vector<32x128xf32>
    %148 = vector.broadcast %145 : vector<1x128xf32> to vector<32x128xf32>
    %149 = arith.addf %147, %148 : vector<32x128xf32>
    %cst_78 = arith.constant 0.000000e+00 : f32
    %150 = vector.broadcast %cst_78 : f32 to vector<32x128xf32>
    %151 = arith.maximumf %149, %150 : vector<32x128xf32>
    %152 = tpu.concatenate %151, %151 in 0 : vector<32x128xf32>, vector<32x128xf32> -> vector<64x128xf32>
    %cst_79 = arith.constant 0.000000e+00 : f32
    %153 = vector.broadcast %cst_79 : f32 to vector<32x128xf32>
    %154 = vector.extract_strided_slice %152 {offsets = [27, 0], sizes = [32, 128], strides = [1, 1]} : vector<64x128xf32> to vector<32x128xf32>
    %c0_80 = arith.constant 0 : index
    %c0_81 = arith.constant 0 : index
    %c0_82 = arith.constant 0 : index
    %155 = vector.load %arg10[%c0_80, %c0_81, %c0_82] : memref<9x32x1xf32, #tpu.memory_space<vmem>>, vector<1x32x1xf32>
    %156 = vector.shape_cast %155 : vector<1x32x1xf32> to vector<32x1xf32>
    %157 = vector.broadcast %156 : vector<32x1xf32> to vector<32x128xf32>
    %158 = arith.mulf %154, %157 : vector<32x128xf32>
    %159 = arith.truncf %158 : vector<32x128xf32> to vector<32x128xbf16>
    %c0_83 = arith.constant 0 : index
    %c0_84 = arith.constant 0 : index
    %c0_85 = arith.constant 0 : index
    %160 = vector.load %arg7[%c0_83, %c0_84, %c0_85] : memref<9x128x128xbf16, #tpu.memory_space<vmem>>, vector<1x128x128xbf16>
    %161 = vector.shape_cast %160 : vector<1x128x128xbf16> to vector<128x128xbf16>
    %cst_86 = arith.constant dense<0.000000e+00> : vector<32x128xf32>
    %162 = tpu.matmul %159, %161, %cst_86 {dimension_numbers = #tpu.dot_dimension_numbers<[1], [0], [0], [1], [0, 0, 1, 1], [], []>} : vector<32x128xbf16>, vector<128x128xbf16>, vector<32x128xf32> -> vector<32x128xf32>
    %163 = arith.addf %153, %162 : vector<32x128xf32>
    %164 = vector.extract_strided_slice %152 {offsets = [28, 0], sizes = [32, 128], strides = [1, 1]} : vector<64x128xf32> to vector<32x128xf32>
    %c1_87 = arith.constant 1 : index
    %c0_88 = arith.constant 0 : index
    %c0_89 = arith.constant 0 : index
    %165 = vector.load %arg10[%c1_87, %c0_88, %c0_89] : memref<9x32x1xf32, #tpu.memory_space<vmem>>, vector<1x32x1xf32>
    %166 = vector.shape_cast %165 : vector<1x32x1xf32> to vector<32x1xf32>
    %167 = vector.broadcast %166 : vector<32x1xf32> to vector<32x128xf32>
    %168 = arith.mulf %164, %167 : vector<32x128xf32>
    %169 = arith.truncf %168 : vector<32x128xf32> to vector<32x128xbf16>
    %c1_90 = arith.constant 1 : index
    %c0_91 = arith.constant 0 : index
    %c0_92 = arith.constant 0 : index
    %170 = vector.load %arg7[%c1_90, %c0_91, %c0_92] : memref<9x128x128xbf16, #tpu.memory_space<vmem>>, vector<1x128x128xbf16>
    %171 = vector.shape_cast %170 : vector<1x128x128xbf16> to vector<128x128xbf16>
    %cst_93 = arith.constant dense<0.000000e+00> : vector<32x128xf32>
    %172 = tpu.matmul %169, %171, %cst_93 {dimension_numbers = #tpu.dot_dimension_numbers<[1], [0], [0], [1], [0, 0, 1, 1], [], []>} : vector<32x128xbf16>, vector<128x128xbf16>, vector<32x128xf32> -> vector<32x128xf32>
    %173 = arith.addf %163, %172 : vector<32x128xf32>
    %174 = vector.extract_strided_slice %152 {offsets = [29, 0], sizes = [32, 128], strides = [1, 1]} : vector<64x128xf32> to vector<32x128xf32>
    %c2_94 = arith.constant 2 : index
    %c0_95 = arith.constant 0 : index
    %c0_96 = arith.constant 0 : index
    %175 = vector.load %arg10[%c2_94, %c0_95, %c0_96] : memref<9x32x1xf32, #tpu.memory_space<vmem>>, vector<1x32x1xf32>
    %176 = vector.shape_cast %175 : vector<1x32x1xf32> to vector<32x1xf32>
    %177 = vector.broadcast %176 : vector<32x1xf32> to vector<32x128xf32>
    %178 = arith.mulf %174, %177 : vector<32x128xf32>
    %179 = arith.truncf %178 : vector<32x128xf32> to vector<32x128xbf16>
    %c2_97 = arith.constant 2 : index
    %c0_98 = arith.constant 0 : index
    %c0_99 = arith.constant 0 : index
    %180 = vector.load %arg7[%c2_97, %c0_98, %c0_99] : memref<9x128x128xbf16, #tpu.memory_space<vmem>>, vector<1x128x128xbf16>
    %181 = vector.shape_cast %180 : vector<1x128x128xbf16> to vector<128x128xbf16>
    %cst_100 = arith.constant dense<0.000000e+00> : vector<32x128xf32>
    %182 = tpu.matmul %179, %181, %cst_100 {dimension_numbers = #tpu.dot_dimension_numbers<[1], [0], [0], [1], [0, 0, 1, 1], [], []>} : vector<32x128xbf16>, vector<128x128xbf16>, vector<32x128xf32> -> vector<32x128xf32>
    %183 = arith.addf %173, %182 : vector<32x128xf32>
    %184 = vector.extract_strided_slice %152 {offsets = [31, 0], sizes = [32, 128], strides = [1, 1]} : vector<64x128xf32> to vector<32x128xf32>
    %c3_101 = arith.constant 3 : index
    %c0_102 = arith.constant 0 : index
    %c0_103 = arith.constant 0 : index
    %185 = vector.load %arg10[%c3_101, %c0_102, %c0_103] : memref<9x32x1xf32, #tpu.memory_space<vmem>>, vector<1x32x1xf32>
    %186 = vector.shape_cast %185 : vector<1x32x1xf32> to vector<32x1xf32>
    %187 = vector.broadcast %186 : vector<32x1xf32> to vector<32x128xf32>
    %188 = arith.mulf %184, %187 : vector<32x128xf32>
    %189 = arith.truncf %188 : vector<32x128xf32> to vector<32x128xbf16>
    %c3_104 = arith.constant 3 : index
    %c0_105 = arith.constant 0 : index
    %c0_106 = arith.constant 0 : index
    %190 = vector.load %arg7[%c3_104, %c0_105, %c0_106] : memref<9x128x128xbf16, #tpu.memory_space<vmem>>, vector<1x128x128xbf16>
    %191 = vector.shape_cast %190 : vector<1x128x128xbf16> to vector<128x128xbf16>
    %cst_107 = arith.constant dense<0.000000e+00> : vector<32x128xf32>
    %192 = tpu.matmul %189, %191, %cst_107 {dimension_numbers = #tpu.dot_dimension_numbers<[1], [0], [0], [1], [0, 0, 1, 1], [], []>} : vector<32x128xbf16>, vector<128x128xbf16>, vector<32x128xf32> -> vector<32x128xf32>
    %193 = arith.addf %183, %192 : vector<32x128xf32>
    %194 = vector.extract_strided_slice %152 {offsets = [0, 0], sizes = [32, 128], strides = [1, 1]} : vector<64x128xf32> to vector<32x128xf32>
    %c4_108 = arith.constant 4 : index
    %c0_109 = arith.constant 0 : index
    %c0_110 = arith.constant 0 : index
    %195 = vector.load %arg10[%c4_108, %c0_109, %c0_110] : memref<9x32x1xf32, #tpu.memory_space<vmem>>, vector<1x32x1xf32>
    %196 = vector.shape_cast %195 : vector<1x32x1xf32> to vector<32x1xf32>
    %197 = vector.broadcast %196 : vector<32x1xf32> to vector<32x128xf32>
    %198 = arith.mulf %194, %197 : vector<32x128xf32>
    %199 = arith.truncf %198 : vector<32x128xf32> to vector<32x128xbf16>
    %c4_111 = arith.constant 4 : index
    %c0_112 = arith.constant 0 : index
    %c0_113 = arith.constant 0 : index
    %200 = vector.load %arg7[%c4_111, %c0_112, %c0_113] : memref<9x128x128xbf16, #tpu.memory_space<vmem>>, vector<1x128x128xbf16>
    %201 = vector.shape_cast %200 : vector<1x128x128xbf16> to vector<128x128xbf16>
    %cst_114 = arith.constant dense<0.000000e+00> : vector<32x128xf32>
    %202 = tpu.matmul %199, %201, %cst_114 {dimension_numbers = #tpu.dot_dimension_numbers<[1], [0], [0], [1], [0, 0, 1, 1], [], []>} : vector<32x128xbf16>, vector<128x128xbf16>, vector<32x128xf32> -> vector<32x128xf32>
    %203 = arith.addf %193, %202 : vector<32x128xf32>
    %204 = vector.extract_strided_slice %152 {offsets = [1, 0], sizes = [32, 128], strides = [1, 1]} : vector<64x128xf32> to vector<32x128xf32>
    %c5_115 = arith.constant 5 : index
    %c0_116 = arith.constant 0 : index
    %c0_117 = arith.constant 0 : index
    %205 = vector.load %arg10[%c5_115, %c0_116, %c0_117] : memref<9x32x1xf32, #tpu.memory_space<vmem>>, vector<1x32x1xf32>
    %206 = vector.shape_cast %205 : vector<1x32x1xf32> to vector<32x1xf32>
    %207 = vector.broadcast %206 : vector<32x1xf32> to vector<32x128xf32>
    %208 = arith.mulf %204, %207 : vector<32x128xf32>
    %209 = arith.truncf %208 : vector<32x128xf32> to vector<32x128xbf16>
    %c5_118 = arith.constant 5 : index
    %c0_119 = arith.constant 0 : index
    %c0_120 = arith.constant 0 : index
    %210 = vector.load %arg7[%c5_118, %c0_119, %c0_120] : memref<9x128x128xbf16, #tpu.memory_space<vmem>>, vector<1x128x128xbf16>
    %211 = vector.shape_cast %210 : vector<1x128x128xbf16> to vector<128x128xbf16>
    %cst_121 = arith.constant dense<0.000000e+00> : vector<32x128xf32>
    %212 = tpu.matmul %209, %211, %cst_121 {dimension_numbers = #tpu.dot_dimension_numbers<[1], [0], [0], [1], [0, 0, 1, 1], [], []>} : vector<32x128xbf16>, vector<128x128xbf16>, vector<32x128xf32> -> vector<32x128xf32>
    %213 = arith.addf %203, %212 : vector<32x128xf32>
    %214 = vector.extract_strided_slice %152 {offsets = [3, 0], sizes = [32, 128], strides = [1, 1]} : vector<64x128xf32> to vector<32x128xf32>
    %c6_122 = arith.constant 6 : index
    %c0_123 = arith.constant 0 : index
    %c0_124 = arith.constant 0 : index
    %215 = vector.load %arg10[%c6_122, %c0_123, %c0_124] : memref<9x32x1xf32, #tpu.memory_space<vmem>>, vector<1x32x1xf32>
    %216 = vector.shape_cast %215 : vector<1x32x1xf32> to vector<32x1xf32>
    %217 = vector.broadcast %216 : vector<32x1xf32> to vector<32x128xf32>
    %218 = arith.mulf %214, %217 : vector<32x128xf32>
    %219 = arith.truncf %218 : vector<32x128xf32> to vector<32x128xbf16>
    %c6_125 = arith.constant 6 : index
    %c0_126 = arith.constant 0 : index
    %c0_127 = arith.constant 0 : index
    %220 = vector.load %arg7[%c6_125, %c0_126, %c0_127] : memref<9x128x128xbf16, #tpu.memory_space<vmem>>, vector<1x128x128xbf16>
    %221 = vector.shape_cast %220 : vector<1x128x128xbf16> to vector<128x128xbf16>
    %cst_128 = arith.constant dense<0.000000e+00> : vector<32x128xf32>
    %222 = tpu.matmul %219, %221, %cst_128 {dimension_numbers = #tpu.dot_dimension_numbers<[1], [0], [0], [1], [0, 0, 1, 1], [], []>} : vector<32x128xbf16>, vector<128x128xbf16>, vector<32x128xf32> -> vector<32x128xf32>
    %223 = arith.addf %213, %222 : vector<32x128xf32>
    %224 = vector.extract_strided_slice %152 {offsets = [4, 0], sizes = [32, 128], strides = [1, 1]} : vector<64x128xf32> to vector<32x128xf32>
    %c7_129 = arith.constant 7 : index
    %c0_130 = arith.constant 0 : index
    %c0_131 = arith.constant 0 : index
    %225 = vector.load %arg10[%c7_129, %c0_130, %c0_131] : memref<9x32x1xf32, #tpu.memory_space<vmem>>, vector<1x32x1xf32>
    %226 = vector.shape_cast %225 : vector<1x32x1xf32> to vector<32x1xf32>
    %227 = vector.broadcast %226 : vector<32x1xf32> to vector<32x128xf32>
    %228 = arith.mulf %224, %227 : vector<32x128xf32>
    %229 = arith.truncf %228 : vector<32x128xf32> to vector<32x128xbf16>
    %c7_132 = arith.constant 7 : index
    %c0_133 = arith.constant 0 : index
    %c0_134 = arith.constant 0 : index
    %230 = vector.load %arg7[%c7_132, %c0_133, %c0_134] : memref<9x128x128xbf16, #tpu.memory_space<vmem>>, vector<1x128x128xbf16>
    %231 = vector.shape_cast %230 : vector<1x128x128xbf16> to vector<128x128xbf16>
    %cst_135 = arith.constant dense<0.000000e+00> : vector<32x128xf32>
    %232 = tpu.matmul %229, %231, %cst_135 {dimension_numbers = #tpu.dot_dimension_numbers<[1], [0], [0], [1], [0, 0, 1, 1], [], []>} : vector<32x128xbf16>, vector<128x128xbf16>, vector<32x128xf32> -> vector<32x128xf32>
    %233 = arith.addf %223, %232 : vector<32x128xf32>
    %234 = vector.extract_strided_slice %152 {offsets = [5, 0], sizes = [32, 128], strides = [1, 1]} : vector<64x128xf32> to vector<32x128xf32>
    %c8_136 = arith.constant 8 : index
    %c0_137 = arith.constant 0 : index
    %c0_138 = arith.constant 0 : index
    %235 = vector.load %arg10[%c8_136, %c0_137, %c0_138] : memref<9x32x1xf32, #tpu.memory_space<vmem>>, vector<1x32x1xf32>
    %236 = vector.shape_cast %235 : vector<1x32x1xf32> to vector<32x1xf32>
    %237 = vector.broadcast %236 : vector<32x1xf32> to vector<32x128xf32>
    %238 = arith.mulf %234, %237 : vector<32x128xf32>
    %239 = arith.truncf %238 : vector<32x128xf32> to vector<32x128xbf16>
    %c8_139 = arith.constant 8 : index
    %c0_140 = arith.constant 0 : index
    %c0_141 = arith.constant 0 : index
    %240 = vector.load %arg7[%c8_139, %c0_140, %c0_141] : memref<9x128x128xbf16, #tpu.memory_space<vmem>>, vector<1x128x128xbf16>
    %241 = vector.shape_cast %240 : vector<1x128x128xbf16> to vector<128x128xbf16>
    %cst_142 = arith.constant dense<0.000000e+00> : vector<32x128xf32>
    %242 = tpu.matmul %239, %241, %cst_142 {dimension_numbers = #tpu.dot_dimension_numbers<[1], [0], [0], [1], [0, 0, 1, 1], [], []>} : vector<32x128xbf16>, vector<128x128xbf16>, vector<32x128xf32> -> vector<32x128xf32>
    %243 = arith.addf %233, %242 : vector<32x128xf32>
    %c0_143 = arith.constant 0 : index
    %c0_144 = arith.constant 0 : index
    %244 = vector.load %arg8[%c0_143, %c0_144] : memref<1x128xf32, #tpu.memory_space<vmem>>, vector<1x128xf32>
    %c0_145 = arith.constant 0 : index
    %c0_146 = arith.constant 0 : index
    %245 = vector.load %arg9[%c0_145, %c0_146] : memref<1x128xf32, #tpu.memory_space<vmem>>, vector<1x128xf32>
    %cst_147 = arith.constant dense<0.000000e+00> : vector<128xf32>
    %246 = vector.multi_reduction <add>, %243, %cst_147 [0] : vector<32x128xf32> to vector<128xf32>
    %247 = vector.shape_cast %246 : vector<128xf32> to vector<1x128xf32>
    %cst_148 = arith.constant 3.200000e+01 : f32
    %248 = vector.broadcast %cst_148 : f32 to vector<1x128xf32>
    %249 = arith.divf %247, %248 : vector<1x128xf32>
    %250 = vector.broadcast %249 : vector<1x128xf32> to vector<32x128xf32>
    %251 = arith.subf %243, %250 : vector<32x128xf32>
    %252 = arith.mulf %251, %251 : vector<32x128xf32>
    %cst_149 = arith.constant dense<0.000000e+00> : vector<128xf32>
    %253 = vector.multi_reduction <add>, %252, %cst_149 [0] : vector<32x128xf32> to vector<128xf32>
    %254 = vector.shape_cast %253 : vector<128xf32> to vector<1x128xf32>
    %cst_150 = arith.constant 3.200000e+01 : f32
    %255 = vector.broadcast %cst_150 : f32 to vector<1x128xf32>
    %256 = arith.divf %254, %255 : vector<1x128xf32>
    %cst_151 = arith.constant 9.99999974E-6 : f32
    %257 = vector.broadcast %cst_151 : f32 to vector<1x128xf32>
    %258 = arith.addf %256, %257 : vector<1x128xf32>
    %259 = math.rsqrt %258 : vector<1x128xf32>
    %260 = arith.mulf %244, %259 : vector<1x128xf32>
    %261 = arith.mulf %249, %260 : vector<1x128xf32>
    %262 = arith.subf %245, %261 : vector<1x128xf32>
    %263 = vector.broadcast %260 : vector<1x128xf32> to vector<32x128xf32>
    %264 = arith.mulf %243, %263 : vector<32x128xf32>
    %265 = vector.broadcast %262 : vector<1x128xf32> to vector<32x128xf32>
    %266 = arith.addf %264, %265 : vector<32x128xf32>
    %267 = arith.addf %266, %34 : vector<32x128xf32>
    %cst_152 = arith.constant 0.000000e+00 : f32
    %268 = vector.broadcast %cst_152 : f32 to vector<32x128xf32>
    %269 = arith.maximumf %267, %268 : vector<32x128xf32>
    %270 = vector.extract_strided_slice %269 {offsets = [0, 0], sizes = [16, 128], strides = [1, 1]} : vector<32x128xf32> to vector<16x128xf32>
    %cst_153 = arith.constant dense<0.000000e+00> : vector<128xf32>
    %271 = vector.multi_reduction <add>, %270, %cst_153 [0] : vector<16x128xf32> to vector<128xf32>
    %272 = vector.shape_cast %271 : vector<128xf32> to vector<1x128xf32>
    %cst_154 = arith.constant 1.600000e+01 : f32
    %273 = vector.broadcast %cst_154 : f32 to vector<1x128xf32>
    %274 = arith.divf %272, %273 : vector<1x128xf32>
    %275 = vector.extract_strided_slice %269 {offsets = [16, 0], sizes = [16, 128], strides = [1, 1]} : vector<32x128xf32> to vector<16x128xf32>
    %cst_155 = arith.constant dense<0.000000e+00> : vector<128xf32>
    %276 = vector.multi_reduction <add>, %275, %cst_155 [0] : vector<16x128xf32> to vector<128xf32>
    %277 = vector.shape_cast %276 : vector<128xf32> to vector<1x128xf32>
    %cst_156 = arith.constant 1.600000e+01 : f32
    %278 = vector.broadcast %cst_156 : f32 to vector<1x128xf32>
    %279 = arith.divf %277, %278 : vector<1x128xf32>
    %280 = tpu.concatenate %274, %279 in 0 : vector<1x128xf32>, vector<1x128xf32> -> vector<2x128xf32>
    %c0_157 = arith.constant 0 : index
    %c0_158 = arith.constant 0 : index
    %281 = vector.load %arg11[%c0_157, %c0_158] : memref<128x128xf32, #tpu.memory_space<vmem>>, vector<128x128xf32>
    %cst_159 = arith.constant dense<0.000000e+00> : vector<2x128xf32>
    %282 = tpu.matmul %280, %281, %cst_159 {dimension_numbers = #tpu.dot_dimension_numbers<[1], [0], [0], [1], [0, 0, 1, 1], [], []>} : vector<2x128xf32>, vector<128x128xf32>, vector<2x128xf32> -> vector<2x128xf32>
    %c0_160 = arith.constant 0 : index
    %c0_161 = arith.constant 0 : index
    %283 = vector.load %arg12[%c0_160, %c0_161] : memref<1x128xf32, #tpu.memory_space<vmem>>, vector<1x128xf32>
    %284 = vector.broadcast %283 : vector<1x128xf32> to vector<2x128xf32>
    %285 = arith.addf %282, %284 : vector<2x128xf32>
    %c0_162 = arith.constant 0 : index
    %c0_163 = arith.constant 0 : index
    %286 = vector.load %arg13[%c0_162, %c0_163] : memref<2x128xf32, #tpu.memory_space<vmem>>, vector<2x128xf32>
    tpu.vector_store %arg13[%c0_162, %c0_163], %285 {strides = array<i32>} : memref<2x128xf32, #tpu.memory_space<vmem>>, vector<2x128xf32>,
    return
  }
}

</mosaic_0001>

<bundles_post_ra>
// kernel: resnet_forward.1
= control target key start
LH: loop header
LB: loop body
LE: loop exit
PB: predicated region body
PF: predicated region fallthrough
CT: control target
= control target key end

     0   :  { %v4958_v2 = vmov 0   ;;  %s6243_s0 = inlined_call_operand.vmem [shape: bf16[128,128], index: 0, kind: input, shape index: {}]   ;;  %s6244_s1 = inlined_call_operand.vmem [shape: bf16[128,128], index: 1, kind: input, shape index: {}]   ;;  %s6245_s2 = inlined_call_operand.vmem [shape: f32[1,128], index: 2, kind: input, shape index: {}]   ;;  %s6246_s3 = inlined_call_operand.vmem [shape: f32[1,128], index: 3, kind: input, shape index: {}]   ;;  %s6247_s4 = inlined_call_operand.vmem [shape: bf16[9,128,128], index: 4, kind: input, shape index: {}]   ;;  %s6248_s5 = inlined_call_operand.vmem [shape: f32[1,128], index: 5, kind: input, shape index: {}]   ;;  %s6249_s6 = inlined_call_operand.vmem [shape: f32[1,128], index: 6, kind: input, shape index: {}]   ;;  %s6250_s7 = inlined_call_operand.vmem [shape: bf16[9,128,128], index: 7, kind: input, shape index: {}]   ;;  %s6251_s8 = inlined_call_operand.vmem [shape: f32[1,128], index: 8, kind: input, shape index: {}]   ;;  %s6252_s9 = inlined_call_operand.vmem [shape: f32[1,128], index: 9, kind: input, shape index: {}]   ;;  %s6253_s10 = inlined_call_operand.vmem [shape: f32[9,32,1], index: 10, kind: input, shape index: {}]   ;;  %s6254_s11 = inlined_call_operand.vmem [shape: f32[128,128], index: 11, kind: input, shape index: {}]   ;;  %s6255_s12 = inlined_call_operand.vmem [shape: f32[1,128], index: 12, kind: input, shape index: {}]   ;;  %s6256_s13 = inlined_call_operand.hbm [shape: f32[2,128], index: 13, kind: output, shape index: {}]  }
   0x1   :  { %v4768_v0 = vld [vmem:[%s6244_s1] sm:$0xff]   ;;  %v4769_v1 = vld [vmem:[%s6244_s1 + $0x8] sm:$0xff]   ;;  %4767 = vset.pattern.permute.xlu1 %v4958_v2  ;;  %4766 = vset.pattern.permute.xlu0 %v4958_v2  ;;  %v4770_v3 = vld [vmem:[%s6244_s1 + $0x10] sm:$0xff]  }
   0x2   :  { %4246 = vmatprep.subr.bf16.mxu0 %v4768_v0  ;;  %v4771_v4 = vld [vmem:[%s6244_s1 + $0x18] sm:$0xff]   ;;  %v4776_v5 = vld [vmem:[%s6243_s0] sm:$0xff]   ;;  %v4773_v7 = vld [vmem:[%s6244_s1 + $0x28] sm:$0xff]  }
   0x3   :  { %4247 = vmatpush3.bf16.msra.mxu0 %v4768_v0  ;;  %4262 = vmatprep.mubr.bf16.mxu0 %v4776_v5  ;;  %v4772_v6 = vld [vmem:[%s6244_s1 + $0x20] sm:$0xff]   ;;  %v3602_v8 = vld [vmem:[%s6253_s10 + $0x30] sm:$0xff]  ;;  %v3603_v10 = vld [vmem:[%s6253_s10 + $0x38] sm:$0xff] }
   0x4   :  { %4248 = vmatprep.subr.bf16.mxu0 %v4769_v1  ;;  %v3600_v9 = vld [vmem:[%s6253_s10 + $0x20] sm:$0xff]  ;;  %499 = vperm.xlu1 %4767, %v3602_v8   ;;  %v3601_v11 = vld [vmem:[%s6253_s10 + $0x28] sm:$0xff]  ;;  %v4774_v12 = vld [vmem:[%s6244_s1 + $0x30] sm:$0xff]  }
   0x5   :  { %491 = vperm.xlu0 %4766, %v3600_v9   ;;  %v428_v13 = vld [vmem:[%s6253_s10 + $0x8] sm:$0xff]  ;;  %v427_v14 = vld [vmem:[%s6253_s10] sm:$0xff]  ;;  %v4775_v15 = vld [vmem:[%s6244_s1 + $0x38] sm:$0xff]  }
   0x6   :  { %v430_v16 = vld [vmem:[%s6253_s10 + $0x18] sm:$0xff]  ;;  %v429_v17 = vld [vmem:[%s6253_s10 + $0x10] sm:$0xff]  ;;  %v4777_v18 = vld [vmem:[%s6243_s0 + $0x8] sm:$0xff]  }
   0x7   :  { %4249 = vmatpush3.bf16.msra.mxu0 %v4769_v1  ;;  %v3637_v19 = vld [vmem:[%s6253_s10 + $0x48] sm:$0xff]  ;;  %v3636_v20 = vld [vmem:[%s6253_s10 + $0x40] sm:$0xff]  ;;  %v4778_v21 = vld [vmem:[%s6243_s0 + $0x10] sm:$0xff]  }
   0x8   :  { %4250 = vmatprep.subr.bf16.mxu0 %v4770_v3  ;;  %503 = vperm.xlu1 %4767, %v3603_v10   ;;  %v3639_v22 = vld [vmem:[%s6253_s10 + $0x58] sm:$0xff]  ;;  %v3638_v23 = vld [vmem:[%s6253_s10 + $0x50] sm:$0xff]  ;;  %v3665_v25 = vld [vmem:[%s6253_s10 + $0x68] sm:$0xff] }
   0x9   :  { %495 = vperm.xlu0 %4766, %v3601_v11   ;;  %v4779_v24 = vld [vmem:[%s6243_s0 + $0x18] sm:$0xff]   ;;  %v3664_v26 = vld [vmem:[%s6253_s10 + $0x60] sm:$0xff]  ;;  %v3666_v29 = vld [vmem:[%s6253_s10 + $0x70] sm:$0xff] }
   0xa   :  { %v4780_v27 = vld [vmem:[%s6243_s0 + $0x20] sm:$0xff]   ;;  %v3667_v28 = vld [vmem:[%s6253_s10 + $0x78] sm:$0xff]  ;;  %v4781_v30 = vld [vmem:[%s6243_s0 + $0x28] sm:$0xff]  }
   0xb   :  { %4251 = vmatpush3.bf16.msra.mxu0 %v4770_v3  ;;  %v3693_v31 = vld [vmem:[%s6253_s10 + $0x88] sm:$0xff]  ;;  %v3692_v32 = vld [vmem:[%s6253_s10 + $0x80] sm:$0xff]  ;;  %v4782_v33 = vld [vmem:[%s6243_s0 + $0x30] sm:$0xff]  }
   0xc   :  { %4252 = vmatprep.subr.bf16.mxu0 %v4771_v4  ;;  %437 = vperm.xlu1 %4767, %v428_v13   ;;  %v3695_v34 = vld [vmem:[%s6253_s10 + $0x98] sm:$0xff]  ;;  %v3694_v35 = vld [vmem:[%s6253_s10 + $0x90] sm:$0xff]  ;;  %v3721_v37 = vld [vmem:[%s6253_s10 + $0xa8] sm:$0xff] }
   0xd   :  { %433 = vperm.xlu0 %4766, %v427_v14   ;;  %v4783_v36 = vld [vmem:[%s6243_s0 + $0x38] sm:$0xff]   ;;  %v3720_v38 = vld [vmem:[%s6253_s10 + $0xa0] sm:$0xff]  ;;  %v3722_v40 = vld [vmem:[%s6253_s10 + $0xb0] sm:$0xff] }
   0xe   :  { %v3723_v39 = vld [vmem:[%s6253_s10 + $0xb8] sm:$0xff]  ;;  %v3749_v41 = vld [vmem:[%s6253_s10 + $0xc8] sm:$0xff]  ;;  %v3748_v42 = vld [vmem:[%s6253_s10 + $0xc0] sm:$0xff] }
   0xf   :  { %4253 = vmatpush3.bf16.msra.mxu0 %v4771_v4  ;;  %v3751_v43 = vld [vmem:[%s6253_s10 + $0xd8] sm:$0xff]  ;;  %v3750_v44 = vld [vmem:[%s6253_s10 + $0xd0] sm:$0xff]  ;;  %v3777_v45 = vld [vmem:[%s6253_s10 + $0xe8] sm:$0xff] }
  0x10   :  { %4254 = vmatprep.subr.bf16.mxu0 %v4772_v6  ;;  %445 = vperm.xlu1 %4767, %v430_v16   ;;  %v3776_v46 = vld [vmem:[%s6253_s10 + $0xe0] sm:$0xff]  ;;  %v3779_v47 = vld [vmem:[%s6253_s10 + $0xf8] sm:$0xff]  ;;  %v3778_v48 = vld [vmem:[%s6253_s10 + $0xf0] sm:$0xff] }
  0x11   :  { %441 = vperm.xlu0 %4766, %v429_v17   ;;  %v3805_v49 = vld [vmem:[%s6253_s10 + $0x108] sm:$0xff]  ;;  %v3804_v50 = vld [vmem:[%s6253_s10 + $0x100] sm:$0xff]  ;;  %v3807_v51 = vld [vmem:[%s6253_s10 + $0x118] sm:$0xff] }
  0x12   :  { %v3806_v52 = vld [vmem:[%s6253_s10 + $0x110] sm:$0xff] }
  0x13   :  { %4255 = vmatpush3.bf16.msra.mxu0 %v4772_v6 }
  0x14   :  { %4256 = vmatprep.subr.bf16.mxu0 %v4773_v7  ;;  %788 = vperm.xlu1 %4767, %v3637_v19  }
  0x15   :  { %784 = vperm.xlu0 %4766, %v3636_v20  }
  0x17   :  { %4257 = vmatpush3.bf16.msra.mxu0 %v4773_v7 }
  0x18   :  { %4258 = vmatprep.subr.bf16.mxu0 %v4774_v12  ;;  %796 = vperm.xlu1 %4767, %v3639_v22  }
  0x19   :  { %792 = vperm.xlu0 %4766, %v3638_v23  }
  0x1b   :  { %4259 = vmatpush3.bf16.msra.mxu0 %v4774_v12 }
  0x1c   :  { %4260 = vmatprep.subr.bf16.mxu0 %v4775_v15  ;;  %977 = vperm.xlu1 %4767, %v3665_v25  }
  0x1d   :  { %973 = vperm.xlu0 %4766, %v3664_v26  }
  0x1f   :  { %4261 = vmatpush3.bf16.msra.mxu0 %v4775_v15 }
  0x20   :  { %985 = vperm.xlu1 %4767, %v3667_v28  }
  0x21   :  { %981 = vperm.xlu0 %4766, %v3666_v29  }
  0x22   :  { %4263 = vmatmul.mubr.bf16.vlgmr.msra.gmra.mrb[0].mxu0 %v4777_v18 }
  0x23   :  { %4266 = vmatprep.mubr.bf16.mxu0 %v4778_v21 }
  0x24   :  { %1167 = vperm.xlu1 %4767, %v3693_v31  }
  0x25   :  { %1162 = vperm.xlu0 %4766, %v3692_v32  }
  0x28   :  { %1177 = vperm.xlu1 %4767, %v3695_v34  }
  0x29   :  { %1172 = vperm.xlu0 %4766, %v3694_v35  }
  0x2a   :  { %4267 = vmatmul.mubr.bf16.gmra.mrb[4].mxu0 %v4779_v24 }
  0x2b   :  { %4270 = vmatprep.mubr.bf16.mxu0 %v4780_v27 }
  0x2c   :  { %1315 = vperm.xlu1 %4767, %v3721_v37  }
  0x2d   :  { %1311 = vperm.xlu0 %4766, %v3720_v38  }
  0x30   :  { %1323 = vperm.xlu1 %4767, %v3723_v39  }
  0x31   :  { %1319 = vperm.xlu0 %4766, %v3722_v40  }
  0x32   :  { %4271 = vmatmul.mubr.bf16.gmra.mrb[8].mxu0 %v4781_v30 }
  0x33   :  { %4274 = vmatprep.mubr.bf16.mxu0 %v4782_v33 }
  0x34   :  { %1498 = vperm.xlu1 %4767, %v3749_v41  }
  0x35   :  { %1494 = vperm.xlu0 %4766, %v3748_v42  }
  0x38   :  { %1506 = vperm.xlu1 %4767, %v3751_v43  }
  0x39   :  { %1502 = vperm.xlu0 %4766, %v3750_v44  }
  0x3a   :  { %4275 = vmatmul.mubr.bf16.gmra.mrb[12].mxu0 %v4783_v36 }
  0x3c   :  { %1685 = vperm.xlu1 %4767, %v3777_v45  }
  0x3d   :  { %1681 = vperm.xlu0 %4766, %v3776_v46  }
  0x40   :  { %1693 = vperm.xlu1 %4767, %v3779_v47  }
  0x41   :  { %1689 = vperm.xlu0 %4766, %v3778_v48  }
  0x44   :  { %1854 = vperm.xlu1 %4767, %v3805_v49  }
  0x45   :  { %1850 = vperm.xlu0 %4766, %v3804_v50  }
  0x48   :  { %1862 = vperm.xlu1 %4767, %v3807_v51  }
  0x49   :  { %1858 = vperm.xlu0 %4766, %v3806_v52  }
  0x4a   :  { %18 = vsyncpa [#allocation3], 0  ;;  %v4784_v53 = vld [vmem:[%s6247_s4 + $0x40] sm:$0xff]   ;;  %v4785_v54 = vld [vmem:[%s6247_s4 + $0x48] sm:$0xff]   ;;  %vm447_vm0 = vcmask 1042432   ;;  %vm505_vm1 = vcmask 1043456  }
  0x4b   :  { %4278 = vmatprep.subr.bf16.mxu1 %v4784_v53  ;;  %v4786_v57 = vld [vmem:[%s6247_s4 + $0x50] sm:$0xff]   ;;  %v4787_v62 = vld [vmem:[%s6247_s4 + $0x58] sm:$0xff]   ;;  %v4788_v6 = vld [vmem:[%s6247_s4 + $0x60] sm:$0xff]   ;;  %vm546_vm2 = vcmask 1045504   ;;  %vm651_vm3 = vsmask.f32 6400 }
  0x4c   :  { %4279 = vmatpush3.bf16.msra.mxu1 %v4784_v53  ;;  %v4789_v11 = vld [vmem:[%s6247_s4 + $0x68] sm:$0xff]   ;;  %v4790_v16 = vld [vmem:[%s6247_s4 + $0x70] sm:$0xff]   ;;  %v4791_v21 = vld [vmem:[%s6247_s4 + $0x78] sm:$0xff]   ;;  %vm798_vm4 = vcmask 1044480   ;;  %vm836_vm5 = vsmask.f32 5376 }
  0x4d   :  { %4280 = vmatprep.subr.bf16.mxu1 %v4785_v54  ;;  %v5262_v26 = vld [vmem:[%s6247_s4] sm:$0xff]   ;;  %vm987_vm6 = vcmask 1046528   ;;  %vm1025_vm7 = vsmask.f32 4352  ;;  %vm1325_vm8 = vcmask 1040384   ;;  %vm4960_vm10 = vmmov 0  }
  0x4e   :  { %vm1363_vm9 = vsmask.f32 7424  ;;  %s4962_s22 = smov [#allocation2]  }
  0x50   :  { %4281 = vmatpush3.bf16.msra.mxu1 %v4785_v54 }
  0x51   :  { %4282 = vmatprep.subr.bf16.mxu1 %v4786_v57 }
  0x54   :  { %4283 = vmatpush3.bf16.msra.mxu1 %v4786_v57 }
  0x55   :  { %4284 = vmatprep.subr.bf16.mxu1 %v4787_v62 }
  0x58   :  { %4285 = vmatpush3.bf16.msra.mxu1 %v4787_v62 }
  0x59   :  { %4286 = vmatprep.subr.bf16.mxu1 %v4788_v6 }
  0x5c   :  { %4287 = vmatpush3.bf16.msra.mxu1 %v4788_v6 }
  0x5d   :  { %4288 = vmatprep.subr.bf16.mxu1 %v4789_v11 }
  0x60   :  { %4289 = vmatpush3.bf16.msra.mxu1 %v4789_v11 }
  0x61   :  { %4290 = vmatprep.subr.bf16.mxu1 %v4790_v16 }
  0x64   :  { %4291 = vmatpush3.bf16.msra.mxu1 %v4790_v16 }
  0x65   :  { %4292 = vmatprep.subr.bf16.mxu1 %v4791_v21 }
  0x68   :  { %4293 = vmatpush3.bf16.msra.mxu1 %v4791_v21 }
  0x69   :  { %4298 = vmatprep.subr.bf16.mxu1 %v5262_v26 }
  0xf5   :  { %v5195_v55 = vpop.f32.mrb[0].mxu0 }
  0xf6   :  { %v5197_v56 = vpop.f32.mrb[1].mxu0 }
  0xf7   :  { %v5202_v58 = vpop.f32.mrb[2].mxu0 }
  0xf8   :  { %v5204_v59 = vpop.f32.mrb[3].mxu0 }
  0xf9   :  { %v273_v60 = vadd.f32 %v5204_v59, %v5197_v56 }
  0xfb   :  { %v274_v61 = vadd.f32 %v5195_v55, %v273_v60 }
  0xfd   :  { %v5212_v63 = vpop.f32.mrb[4].mxu0  ;;  %v275_v0 = vadd.f32 %v5202_v58, %v274_v61 }
  0xfe   :  { %v5215_v1 = vpop.f32.mrb[5].mxu0 }
  0xff   :  { %v276_v2 = vadd.f32 %v275_v0, %v5215_v1  ;;  %v5218_v3 = vpop.f32.mrb[6].mxu0 }
 0x100   :  { %v5220_v4 = vpop.f32.mrb[7].mxu0 }
 0x101   :  { %v277_v5 = vadd.f32 %v276_v2, %v5220_v4 }
 0x103   :  { %v278_v7 = vadd.f32 %v5212_v63, %v277_v5 }
 0x105   :  { %v5227_v8 = vpop.f32.mrb[8].mxu0  ;;  %v279_v9 = vadd.f32 %v5218_v3, %v278_v7 }
 0x106   :  { %v5230_v10 = vpop.f32.mrb[9].mxu0 }
 0x107   :  { %v280_v12 = vadd.f32 %v279_v9, %v5230_v10  ;;  %v5236_v13 = vpop.f32.mrb[10].mxu0 }
 0x108   :  { %v5238_v14 = vpop.f32.mrb[11].mxu0 }
 0x109   :  { %v281_v15 = vadd.f32 %v280_v12, %v5238_v14 }
 0x10b   :  { %v282_v17 = vadd.f32 %v5227_v8, %v281_v15 }
 0x10d   :  { %v5245_v18 = vpop.f32.mrb[12].mxu0  ;;  %v283_v19 = vadd.f32 %v5236_v13, %v282_v17 }
 0x10e   :  { %v5248_v20 = vpop.f32.mrb[13].mxu0 }
 0x10f   :  { %v284_v22 = vadd.f32 %v283_v19, %v5248_v20  ;;  %v5254_v23 = vpop.f32.mrb[14].mxu0 }
 0x110   :  { %v5256_v24 = vpop.f32.mrb[15].mxu0 }
 0x111   :  { %v285_v25 = vadd.f32 %v284_v22, %v5256_v24 }
 0x113   :  { %v286_v27 = vadd.f32 %v5245_v18, %v285_v25 }
 0x115   :  { %v287_v28 = vadd.f32 %v5254_v23, %v286_v27 }
 0x117   :  { %v288_v29 = vrot.slane %v287_v28, 4 }
 0x119   :  { %v289_v30 = vadd.f32 %v288_v29, %v287_v28 }
 0x11b   :  { %v290_v31 = vrot.slane %v289_v30, 2 }
 0x11d   :  { %v291_v32 = vadd.f32 %v290_v31, %v289_v30 }
 0x11f   :  { %v292_v33 = vrot.slane %v291_v32, 1 }
 0x121   :  { %v293_v34 = vadd.f32 %v292_v33, %v291_v32 }
 0x123   :  { %v5267_v35 = vmul.f32 0.0078125, %v293_v34 }
 0x125   :  { %v296_v36 = vsub.f32 %v5197_v56, %v5267_v35  ;;  %v297_v37 = vsub.f32 %v5204_v59, %v5267_v35  ;;  %v298_v38 = vsub.f32 %v5195_v55, %v5267_v35  ;;  %v299_v39 = vsub.f32 %v5202_v58, %v5267_v35 }
 0x126   :  { %v300_v40 = vsub.f32 %v5215_v1, %v5267_v35  ;;  %v301_v41 = vsub.f32 %v5220_v4, %v5267_v35  ;;  %v302_v42 = vsub.f32 %v5212_v63, %v5267_v35  ;;  %v303_v43 = vsub.f32 %v5218_v3, %v5267_v35 }
 0x127   :  { %v304_v44 = vsub.f32 %v5230_v10, %v5267_v35  ;;  %v305_v45 = vsub.f32 %v5238_v14, %v5267_v35  ;;  %v306_v46 = vsub.f32 %v5227_v8, %v5267_v35  ;;  %v307_v47 = vsub.f32 %v5236_v13, %v5267_v35 }
 0x128   :  { %v308_v48 = vsub.f32 %v5248_v20, %v5267_v35  ;;  %v309_v49 = vsub.f32 %v5256_v24, %v5267_v35  ;;  %v310_v50 = vsub.f32 %v5245_v18, %v5267_v35  ;;  %v311_v51 = vsub.f32 %v5254_v23, %v5267_v35 }
 0x129   :  { %v312_v52 = vmul.f32 %v296_v36, %v296_v36  ;;  %v313_v53 = vmul.f32 %v297_v37, %v297_v37  ;;  %v314_v54 = vmul.f32 %v298_v38, %v298_v38  ;;  %v315_v60 = vmul.f32 %v299_v39, %v299_v39 }
 0x12a   :  { %v316_v62 = vmul.f32 %v300_v40, %v300_v40  ;;  %v317_v2 = vmul.f32 %v301_v41, %v301_v41  ;;  %v318_v6 = vmul.f32 %v302_v42, %v302_v42  ;;  %v319_v9 = vmul.f32 %v303_v43, %v303_v43 }
 0x12b   :  { %v328_v57 = vadd.f32 %v313_v53, %v312_v52  ;;  %v320_v12 = vmul.f32 %v304_v44, %v304_v44  ;;  %v321_v16 = vmul.f32 %v305_v45, %v305_v45  ;;  %v322_v19 = vmul.f32 %v306_v46, %v306_v46 }
 0x12c   :  { %v323_v22 = vmul.f32 %v307_v47, %v307_v47  ;;  %v324_v27 = vmul.f32 %v308_v48, %v308_v48  ;;  %v325_v29 = vmul.f32 %v309_v49, %v309_v49  ;;  %v326_v31 = vmul.f32 %v310_v50, %v310_v50  ;;  %v271_v47 = vld [vmem:[%s6245_s2] sm:$0x1]  ;;  %s3576_s2 = sshll.u32 %s4962_s22, 4  ;;  %s3577_s2 = int_to_ptr.vmem [resolvable:$true] %s3576_s2 }
 0x12d   :  { %v329_v61 = vadd.f32 %v328_v57, %v314_v54  ;;  %v327_v33 = vmul.f32 %v311_v51, %v311_v51  ;;  %v356_v45 = vlaneseq  ;;  %v272_v51 = vld [vmem:[%s6246_s3] sm:$0x1]  ;;  %s4934_s3 = scalar_lea.vmem %s3577_s2, 32  ;;  %p4939_p1 = scmp.lt.s32.totalorder %s3577_s2, %s3577_s2 }
 0x12e   :  { %p4935_p0 = scmp.ne.s32.totalorder %s3577_s2, %s4934_s3  ;;  %p4940_p2 = scmp.lt.s32.totalorder %s4934_s3, %s4934_s3 }
 0x12f   :  { %v330_v0 = vadd.f32 %v329_v61, %v315_v60  ;;  %v357_v46 = vshrl.u32 %v356_v45, 7 }
 0x130   :  { %p4941_p3 = por %p4940_p2, %p4939_p1 }
 0x131   :  { %v331_v5 = vadd.f32 %v330_v0, %v316_v62  ;;  %v5304_v48 = vsub.s32 0, %v357_v46 }
 0x132   :  { %p4942_p4 = pnand %p4941_p3, %p4935_p0 }
 0x133   :  { %v332_v7 = vadd.f32 %v331_v5, %v317_v2 }
 0x135   :  { %v333_v11 = vadd.f32 %v332_v7, %v318_v6 }
 0x137   :  { %v334_v15 = vadd.f32 %v333_v11, %v319_v9 }
 0x139   :  { %v335_v17 = vadd.f32 %v334_v15, %v320_v12  ;;  %v492_v12 = vpop.permute.xlu0 %491 }
 0x13b   :  { %v336_v21 = vadd.f32 %v335_v17, %v321_v16 }
 0x13d   :  { %v337_v25 = vadd.f32 %v336_v21, %v322_v19 }
 0x13f   :  { %v338_v28 = vadd.f32 %v337_v25, %v323_v22 }
 0x141   :  { %v339_v30 = vadd.f32 %v338_v28, %v324_v27 }
 0x143   :  { %v340_v32 = vadd.f32 %v339_v30, %v325_v29 }
 0x145   :  { %v341_v34 = vadd.f32 %v340_v32, %v326_v31 }
 0x147   :  { %v342_v36 = vadd.f32 %v341_v34, %v327_v33 }
 0x149   :  { %v343_v37 = vrot.slane %v342_v36, 4 }
 0x14b   :  { %v344_v38 = vadd.f32 %v343_v37, %v342_v36 }
 0x14d   :  { %v345_v39 = vrot.slane %v344_v38, 2 }
 0x14f   :  { %v346_v40 = vadd.f32 %v345_v39, %v344_v38 }
 0x151   :  { %v347_v41 = vrot.slane %v346_v40, 1 }
 0x153   :  { %v348_v42 = vadd.f32 %v347_v41, %v346_v40 }
 0x155   :  { %v349_v43 = vmul.f32 0.0078125, %v348_v42  ;;  %v496_v42 = vpop.permute.xlu0 %495 }
 0x157   :  { %v350_v44 = vadd.f32 1e-05, %v349_v43 }
 0x159   :  { %4928 = vrsqrt.f32 %v350_v44 }
 0x163   :  { %v4929_v49 = vpop.eup %4928 }
 0x164   :  { %v352_v50 = vmul.f32 %v4929_v49, %v271_v47 }
 0x166   :  { %v353_v52 = vmul.f32 %v352_v50, %v5267_v35  ;;  %v359_v53 = vrot.slane %v352_v50, %v5304_v48 }
 0x168   :  { %v354_v54 = vsub.f32 %v272_v51, %v353_v52  ;;  %v362_v57 = vmul.f32 %v359_v53, %v5204_v59  ;;  %v366_v60 = vmul.f32 %v359_v53, %v5220_v4  ;;  %v370_v61 = vmul.f32 %v359_v53, %v5238_v14 }
 0x169   :  { %v374_v62 = vmul.f32 %v359_v53, %v5256_v24  ;;  %v364_v0 = vmul.f32 %v5202_v58, %v359_v53  ;;  %v368_v2 = vmul.f32 %v5218_v3, %v359_v53  ;;  %v372_v5 = vmul.f32 %v5236_v13, %v359_v53 }
 0x16a   :  { %v381_v6 = vrot.slane %v354_v54, %v5304_v48  ;;  %v376_v35 = vmul.f32 %v5254_v23, %v359_v53  ;;  %v363_v7 = vmul.f32 %v5195_v55, %v359_v53  ;;  %v367_v59 = vmul.f32 %v5212_v63, %v359_v53 }
 0x16b   :  { %v371_v4 = vmul.f32 %v5227_v8, %v359_v53  ;;  %v375_v14 = vmul.f32 %v5245_v18, %v359_v53  ;;  %v361_v24 = vmul.f32 %v359_v53, %v5197_v56  ;;  %v365_v58 = vmul.f32 %v359_v53, %v5215_v1  ;;  %v5326_v8 = vpop.permute.xlu1 %499 }
 0x16c   :  { %v384_v9 = vadd.f32 %v381_v6, %v362_v57  ;;  %v388_v3 = vadd.f32 %v381_v6, %v366_v60  ;;  %v392_v11 = vadd.f32 %v381_v6, %v370_v61  ;;  %v396_v13 = vadd.f32 %v381_v6, %v374_v62 }
 0x16d   :  { %v386_v15 = vadd.f32 %v381_v6, %v364_v0  ;;  %v390_v16 = vadd.f32 %v381_v6, %v368_v2  ;;  %v394_v23 = vadd.f32 %v381_v6, %v372_v5  ;;  %v398_v17 = vadd.f32 %v381_v6, %v376_v35  ;;  %v434_v0 = vpop.permute.xlu0 %433 }
 0x16e   :  { %v400_v55 = vmax.f32 %v384_v9, 0.0  ;;  %v404_v19 = vmax.f32 %v388_v3, 0.0  ;;  %v408_v63 = vmax.f32 %v392_v11, 0.0  ;;  %v412_v21 = vmax.f32 %v396_v13, 0.0 }
 0x16f   :  { %v402_v18 = vmax.f32 %v386_v15, 0.0  ;;  %v406_v22 = vmax.f32 %v390_v16, 0.0  ;;  %v410_v56 = vmax.f32 %v394_v23, 0.0  ;;  %v414_v25 = vmax.f32 %v398_v17, 0.0  ;;  %v504_v44 = vpop.permute.xlu1 %503 }
 0x170   :  { %v416_v1 = vmax.f32 %v400_v55, %v404_v19  ;;  %v420_v27 = vmax.f32 %v408_v63, %v412_v21  ;;  %v385_v28 = vadd.f32 %v381_v6, %v363_v7  ;;  %v389_v29 = vadd.f32 %v381_v6, %v367_v59 }
 0x171   :  { %v418_v30 = vmax.f32 %v402_v18, %v406_v22  ;;  %v422_v31 = vmax.f32 %v410_v56, %v414_v25  ;;  %v393_v32 = vadd.f32 %v381_v6, %v371_v4  ;;  %v397_v33 = vadd.f32 %v381_v6, %v375_v14 }
 0x172   :  { %v5328_v34 = vmax.f32 %v416_v1, %v420_v27  ;;  %v401_v36 = vmax.f32 %v385_v28, 0.0  ;;  %v405_v37 = vmax.f32 %v389_v29, 0.0  ;;  %v369_v38 = vmul.f32 %v359_v53, %v5230_v10 }
 0x173   :  { %v5331_v39 = vmax.f32 %v418_v30, %v422_v31  ;;  %v409_v40 = vmax.f32 %v393_v32, 0.0  ;;  %v413_v41 = vmax.f32 %v397_v33, 0.0  ;;  %v373_v43 = vmul.f32 %v359_v53, %v5248_v20  ;;  %v438_v2 = vpop.permute.xlu1 %437  ;;  %v442_v20 = vpop.permute.xlu0 %441 }
 0x174   :  { %6269 = vst [vmem:[#allocation5_spill] sm:$0xff] %v5328_v34  ;;  %v417_v45 = vmax.f32 %v401_v36, %v405_v37  ;;  %v383_v46 = vadd.f32 %v381_v6, %v361_v24  ;;  %v387_v47 = vadd.f32 %v381_v6, %v365_v58  ;;  %v391_v49 = vadd.f32 %v381_v6, %v369_v38 }
 0x175   :  { %6270 = vst [vmem:[#allocation6_spill] sm:$0xff] %v5331_v39  ;;  %v421_v50 = vmax.f32 %v409_v40, %v413_v41  ;;  %v395_v51 = vadd.f32 %v381_v6, %v373_v43  ;;  %v449_v53 = vrot.slane %v438_v2, 5  ;;  %v5338_v35 = vrot.slane %v434_v0, 5  ;;  %v4793_v43 = vld [vmem:[%s6247_s4 + $0x8] sm:$0xff]   ;;  %v4796_v0 = vld [vmem:[%s6247_s4 + $0x20] sm:$0xff]  }
 0x176   :  { %v399_v52 = vmax.f32 %v383_v46, 0.0  ;;  %v403_v54 = vmax.f32 %v387_v47, 0.0  ;;  %v407_v57 = vmax.f32 %v391_v49, 0.0  ;;  %v451_v59 = vrot.slane %v442_v20, 5 }
 0x177   :  { %v5334_v60 = vmax.f32 %v417_v45, %v421_v50  ;;  %v411_v10 = vmax.f32 %v395_v51, 0.0  ;;  %v446_v7 = vpop.permute.xlu1 %445  ;;  %v5342_v4 = vrot.slane %v492_v12, 4  ;;  %v5344_v14 = vrot.slane %v504_v44, 4  ;;  %v785_v47 = vpop.permute.xlu0 %784  ;;  %v4794_v51 = vld [vmem:[%s6247_s4 + $0x10] sm:$0xff]  }
 0x178   :  { %v415_v61 = vmax.f32 %v399_v52, %v403_v54  ;;  %v5340_v6 = vrot.slane %v446_v7, 5  ;;  %v507_v24 = vrot.slane %v496_v42, 4  ;;  %v509_v58 = vrot.slane %v5326_v8, 4 }
 0x179   :  { %6271 = vst [vmem:[#allocation7_spill] sm:$0xff] %v5334_v60  ;;  %v419_v62 = vmax.f32 %v407_v57, %v411_v10  ;;  %v5349_v9 = vsel %vm447_vm0, %v5338_v35, %v449_v53  ;;  %v5352_v3 = vsel %vm447_vm0, %v449_v53, %v451_v59  ;;  %v522_v11 = vmul.f32 %v5344_v14, %v5331_v39  ;;  %v4795_v57 = vld [vmem:[%s6247_s4 + $0x18] sm:$0xff]  }
 0x17a   :  { %v460_v13 = vmul.f32 %v5338_v35, %v5331_v39  ;;  %v5362_v15 = vsel %vm447_vm0, %v451_v59, %v5340_v6  ;;  %v462_v16 = vmul.f32 %v5352_v3, %v5328_v34  ;;  %v5370_v17 = vsel %vm505_vm1, %v5342_v4, %v507_v24 }
 0x17b   :  { %v5336_v5 = vmax.f32 %v415_v61, %v419_v62  ;;  %v463_v23 = vmul.f32 %v5362_v15, %v5334_v60  ;;  %v518_v55 = vmul.f32 %v5342_v4, %v5331_v39  ;;  %v5376_v19 = vsel %vm505_vm1, %v509_v58, %v5344_v14  ;;  %v789_v46 = vpop.permute.xlu1 %788  ;;  %v793_v54 = vpop.permute.xlu0 %792 }
 0x17c   :  { %v5379_v63 = vsel %vm505_vm1, %v507_v24, %v509_v58  ;;  %v521_v8 = vmul.f32 %v5376_v19, %v5334_v60  ;;  %v525_v18 = vpack.c.bf16 %v522_v11, %v522_v11  ;;  %v800_v10 = vrot.slane %v789_v46, 3 }
 0x17d   :  { %6272 = vst [vmem:[#allocation8_spill] sm:$0xff] %v5336_v5  ;;  %v461_v12 = vmul.f32 %v5349_v9, %v5336_v5  ;;  %v519_v21 = vmul.f32 %v5370_v17, %v5336_v5  ;;  %v520_v22 = vmul.f32 %v5379_v63, %v5328_v34  ;;  %v466_v25 = vpack.c.bf16 %v463_v23, %v462_v16 }
 0x17e   :  { %v550_v27 = vrot.slane %v525_v18, 2  ;;  %v5400_v61 = vrot.slane %v785_v47, 3  ;;  %v802_v62 = vrot.slane %v793_v54, 3  ;;  %v464_v2 = vmul.f32 %v5340_v6, %v5331_v39 }
 0x17f   :  { %v465_v56 = vpack.c.bf16 %v461_v12, %v460_v13  ;;  %v523_v1 = vpack.c.bf16 %v519_v21, %v518_v55  ;;  %v524_v28 = vpack.c.bf16 %v521_v8, %v520_v22  ;;  %v661_v32 = vshrl.u32 %v466_v25, 16  ;;  %v797_v52 = vpop.permute.xlu1 %796  ;;  %v4797_v13 = vld [vmem:[%s6247_s4 + $0x28] sm:$0xff]   ;;  %v4798_v55 = vld [vmem:[%s6247_s4 + $0x30] sm:$0xff]  }
 0x180   :  { %v664_v38 = vshll.u32 %v466_v25, 16  ;;  %v5411_v20 = vsel %vm798_vm4, %v5400_v61, %v800_v10  ;;  %v5414_v53 = vsel %vm798_vm4, %v800_v10, %v802_v62  ;;  %v811_v59 = vmul.f32 %v5400_v61, %v5331_v39 }
 0x181   :  { %v653_v29 = vshrl.u32 %v465_v56, 16  ;;  %v656_v30 = vshll.u32 %v465_v56, 16  ;;  %v547_v31 = vrot.slane %v523_v1, 2  ;;  %v548_v33 = vrot.slane %v524_v28, 2  ;;  %v4799_v1 = vld [vmem:[%s6247_s4 + $0x38] sm:$0xff]  }
 0x182   :  { %v663_v40 = vrot.slane %v661_v32, 1  ;;  %v666_v45 = vrot.slane %v664_v38, 2  ;;  %v812_v24 = vmul.f32 %v5411_v20, %v5336_v5  ;;  %v813_v58 = vmul.f32 %v5414_v53, %v5328_v34 }
 0x183   :  { %v655_v36 = vrot.slane %v653_v29, 1  ;;  %v658_v37 = vrot.slane %v656_v30, 2  ;;  %v549_v41 = vsel %vm546_vm2, %v547_v31, %v548_v33  ;;  %v551_v42 = vsel %vm546_vm2, %v548_v33, %v550_v27  ;;  %v4800_v33 = vld [vmem:[%s6247_s4 + $0x80] sm:$0xff]  }
 0x184   :  { %4294 = vmatprep.mubr.bf16.mxu1 %v549_v41  ;;  %v667_v49 = vor.u32 %v666_v45, %v663_v40  ;;  %v467_v12 = vpack.c.bf16 %v464_v2, %v464_v2  ;;  %v816_v16 = vpack.c.bf16 %v812_v24, %v811_v59  ;;  %v4801_v40 = vld [vmem:[%s6247_s4 + $0x88] sm:$0xff]   ;;  %v4802_v45 = vld [vmem:[%s6247_s4 + $0x90] sm:$0xff]  }
 0x185   :  { %v659_v44 = vor.u32 %v658_v37, %v655_v36  ;;  %4295 = vmatmul.mubr.bf16.vlgmr.msra.gmra.mrb[0].mxu1 %v551_v42  ;;  %v978_v42 = vpop.permute.xlu1 %977 }
 0x186   :  { %4299 = vmatpush3.bf16.msra.mxu1 %v5262_v26  ;;  %v5402_v26 = vrot.slane %v797_v52, 3  ;;  %v670_v21 = vshrl.u32 %v467_v12, 16  ;;  %v673_v8 = vshll.u32 %v467_v12, 16  ;;  %v838_v18 = vshrl.u32 %v816_v16, 16 }
 0x187   :  { %4300 = vmatprep.subr.bf16.mxu1 %v4793_v43  ;;  %v668_v50 = vsel %vm651_vm3, %v659_v44, %v667_v49  ;;  %v841_v22 = vshll.u32 %v816_v16, 16 }
 0x188   :  { %4314 = vmatprep.mubr.bf16.mxu1 %v668_v50  ;;  %v5418_v7 = vsel %vm798_vm4, %v802_v62, %v5402_v26  ;;  %v672_v27 = vrot.slane %v670_v21, 1  ;;  %v675_v28 = vrot.slane %v673_v8, 2  ;;  %v840_v29 = vrot.slane %v838_v18, 2 }
 0x189   :  { %v814_v11 = vmul.f32 %v5418_v7, %v5334_v60  ;;  %v843_v30 = vrot.slane %v841_v22, 3  ;;  %v986_v46 = vpop.permute.xlu1 %985  ;;  %v989_v50 = vrot.slane %v978_v42, 1  ;;  %v815_v10 = vmul.f32 %v5402_v26, %v5331_v39 }
 0x18a   :  { %4301 = vmatpush3.bf16.msra.mxu1 %v4793_v43  ;;  %v676_v36 = vor.u32 %v675_v28, %v672_v27  ;;  %v974_v43 = vpop.permute.xlu0 %973  ;;  %v5456_v52 = vrot.slane %v986_v46, 1 }
 0x18b   :  { %4302 = vmatprep.subr.bf16.mxu1 %v4794_v51  ;;  %v817_v23 = vpack.c.bf16 %v814_v11, %v813_v58  ;;  %v844_v37 = vor.u32 %v843_v30, %v840_v29  ;;  %v818_v12 = vpack.c.bf16 %v815_v10, %v815_v10  ;;  %v4815_v10 = vld [vmem:[%s6247_s4 + $0xf8] sm:$0xff]  }
 0x18c   :  { %v677_v41 = vsel %vm651_vm3, %v667_v49, %v676_v36  ;;  %v4803_v49 = vld [vmem:[%s6247_s4 + $0x98] sm:$0xff]   ;;  %v1004_v46 = vmul.f32 %v5456_v52, %v5331_v39 }
 0x18d   :  { %v846_v56 = vshrl.u32 %v817_v23, 16  ;;  %v849_v25 = vshll.u32 %v817_v23, 16  ;;  %v855_v21 = vshrl.u32 %v818_v12, 16  ;;  %v858_v8 = vshll.u32 %v818_v12, 16 }
 0x18e   :  { %4303 = vmatpush3.bf16.msra.mxu1 %v4794_v51  ;;  %v982_v47 = vpop.permute.xlu0 %981  ;;  %v5454_v51 = vrot.slane %v974_v43, 1 }
 0x18f   :  { %4304 = vmatprep.subr.bf16.mxu1 %v4795_v57  ;;  %v848_v31 = vrot.slane %v846_v56, 2  ;;  %v851_v32 = vrot.slane %v849_v25, 3  ;;  %v991_v54 = vrot.slane %v982_v47, 1  ;;  %v857_v27 = vrot.slane %v855_v21, 2  ;;  %v4813_v47 = vld [vmem:[%s6247_s4 + $0xe8] sm:$0xff]  }
 0x190   :  { %v5464_v62 = vsel %vm987_vm6, %v5454_v51, %v989_v50  ;;  %v1000_v59 = vmul.f32 %v5454_v51, %v5331_v39  ;;  %v860_v28 = vrot.slane %v858_v8, 3 }
 0x191   :  { %v5440_v38 = vor.u32 %v851_v32, %v848_v31  ;;  %v5469_v2 = vsel %vm987_vm6, %v991_v54, %v5456_v52  ;;  %v1001_v24 = vmul.f32 %v5464_v62, %v5336_v5 }
 0x192   :  { %4305 = vmatpush3.bf16.msra.mxu1 %v4795_v57  ;;  %v4804_v57 = vld [vmem:[%s6247_s4 + $0xa0] sm:$0xff]   ;;  %v1003_v11 = vmul.f32 %v5469_v2, %v5334_v60  ;;  %v861_v36 = vor.u32 %v860_v28, %v857_v27  ;;  %v4819_v27 = vld [vmem:[%s6247_s4 + $0x118] sm:$0xff]  }
 0x193   :  { %4306 = vmatprep.subr.bf16.mxu1 %v4796_v0  ;;  %v853_v44 = vsel %vm836_vm5, %v844_v37, %v5440_v38  ;;  %v1005_v16 = vpack.c.bf16 %v1001_v24, %v1000_v59 }
 0x194   :  { %v862_v42 = vsel %vm836_vm5, %v5440_v38, %v861_v36  ;;  %v4812_v38 = vld [vmem:[%s6247_s4 + $0xe0] sm:$0xff]  }
 0x195   :  { %v1027_v18 = vshrl.u32 %v1005_v16, 16  ;;  %v1030_v22 = vshll.u32 %v1005_v16, 16 }
 0x196   :  { %4307 = vmatpush3.bf16.msra.mxu1 %v4796_v0  ;;  %v5466_v0 = vsel %vm987_vm6, %v989_v50, %v991_v54  ;;  %v4814_v50 = vld [vmem:[%s6247_s4 + $0xf0] sm:$0xff]  }
 0x197   :  { %4308 = vmatprep.subr.bf16.mxu1 %v4797_v13  ;;  %v1002_v58 = vmul.f32 %v5466_v0, %v5328_v34  ;;  %v1029_v29 = vrot.slane %v1027_v18, 3  ;;  %v1032_v30 = vrot.slane %v1030_v22, 4 }
 0x199   :  { %v1006_v23 = vpack.c.bf16 %v1003_v11, %v1002_v58  ;;  %v1033_v37 = vor.u32 %v1032_v30, %v1029_v29  ;;  %v5517_v58 = vpop.permute.xlu1 %1167  ;;  %v5519_v11 = vpop.permute.xlu0 %1162  ;;  %v4820_v30 = vld [vmem:[%s6247_s4 + $0x120] sm:$0xff]  }
 0x19a   :  { %4309 = vmatpush3.bf16.msra.mxu1 %v4797_v13  ;;  %v4805_v13 = vld [vmem:[%s6247_s4 + $0xa8] sm:$0xff]   ;;  %v1181_v12 = vmul.f32 %v5517_v58, %v5328_v34  ;;  %v1180_v16 = vmul.f32 %v5519_v11, %v5336_v5 }
 0x19b   :  { %4310 = vmatprep.subr.bf16.mxu1 %v4798_v55  ;;  %v1035_v56 = vshrl.u32 %v1006_v23, 16  ;;  %v1038_v25 = vshll.u32 %v1006_v23, 16 }
 0x19c   :  { %v1184_v21 = vpack.c.bf16 %v1181_v12, %v1180_v16 }
 0x19d   :  { %v1037_v31 = vrot.slane %v1035_v56, 3  ;;  %v1040_v32 = vrot.slane %v1038_v25, 4  ;;  %v5532_v18 = vpop.permute.xlu1 %1177  ;;  %v5534_v22 = vpop.permute.xlu0 %1172  ;;  %v4818_v56 = vld [vmem:[%s6247_s4 + $0x110] sm:$0xff]  }
 0x19e   :  { %4311 = vmatpush3.bf16.msra.mxu1 %v4798_v55  ;;  %v4806_v55 = vld [vmem:[%s6247_s4 + $0xb0] sm:$0xff]  }
 0x19f   :  { %4312 = vmatprep.subr.bf16.mxu1 %v4799_v1 }
 0x1a1   :  { %v1316_v25 = vpop.permute.xlu1 %1315 }
 0x1a2   :  { %4313 = vmatpush3.bf16.msra.mxu1 %v4799_v1  ;;  %v4807_v1 = vld [vmem:[%s6247_s4 + $0xb8] sm:$0xff]   ;;  %v1327_v28 = vrot.slane %v1316_v25, 7 }
 0x1a3   :  { %4318 = vmatprep.subr.bf16.mxu1 %v4800_v33 }
 0x1a5   :  { %4315 = vmatmul.mubr.bf16.vlgmr.msra.gmra.mrb[0].mxu1 %v677_v41  ;;  %v4809_v41 = vld [vmem:[%s6247_s4 + $0xc8] sm:$0xff]   ;;  %v1324_v36 = vpop.permute.xlu1 %1323 }
 0x1a6   :  { %4319 = vmatpush3.bf16.msra.mxu1 %v4800_v33  ;;  %4334 = vmatprep.mubr.bf16.mxu1 %v853_v44  ;;  %v4808_v33 = vld [vmem:[%s6247_s4 + $0xc0] sm:$0xff]   ;;  %v4810_v44 = vld [vmem:[%s6247_s4 + $0xd0] sm:$0xff]  }
 0x1a7   :  { %4320 = vmatprep.subr.bf16.mxu1 %v4801_v40 }
 0x1aa   :  { %4321 = vmatpush3.bf16.msra.mxu1 %v4801_v40  ;;  %v1041_v40 = vor.u32 %v1040_v32, %v1037_v31 }
 0x1ab   :  { %4322 = vmatprep.subr.bf16.mxu1 %v4802_v45 }
 0x1ac   :  { %v1042_v43 = vsel %vm1025_vm7, %v1033_v37, %v1041_v40 }
 0x1ae   :  { %4323 = vmatpush3.bf16.msra.mxu1 %v4802_v45  ;;  %v4811_v45 = vld [vmem:[%s6247_s4 + $0xd8] sm:$0xff]  }
 0x1af   :  { %4324 = vmatprep.subr.bf16.mxu1 %v4803_v49 }
 0x1b2   :  { %4325 = vmatpush3.bf16.msra.mxu1 %v4803_v49  ;;  %v1007_v49 = vpack.c.bf16 %v1004_v46, %v1004_v46 }
 0x1b3   :  { %4326 = vmatprep.subr.bf16.mxu1 %v4804_v57 }
 0x1b4   :  { %v1044_v54 = vshrl.u32 %v1007_v49, 16 }
 0x1b6   :  { %4327 = vmatpush3.bf16.msra.mxu1 %v4804_v57  ;;  %v1047_v57 = vshll.u32 %v1007_v49, 16  ;;  %v1046_v59 = vrot.slane %v1044_v54, 3  ;;  %v4823_v54 = vld [vmem:[%s6247_s4 + $0x138] sm:$0xff]  }
 0x1b7   :  { %4328 = vmatprep.subr.bf16.mxu1 %v4805_v13 }
 0x1b8   :  { %v1049_v24 = vrot.slane %v1047_v57, 4 }
 0x1ba   :  { %4329 = vmatpush3.bf16.msra.mxu1 %v4805_v13  ;;  %v4816_v13 = vld [vmem:[%s6247_s4 + $0x100] sm:$0xff]   ;;  %v1050_v23 = vor.u32 %v1049_v24, %v1046_v59  ;;  %v1182_v59 = vmul.f32 %v5534_v22, %v5334_v60 }
 0x1bb   :  { %4330 = vmatprep.subr.bf16.mxu1 %v4806_v55  ;;  %v4824_v24 = vld [vmem:[%s6247_s4 + $0x140] sm:$0xff]  }
 0x1bc   :  { %v1051_v8 = vsel %vm1025_vm7, %v1041_v40, %v1050_v23  ;;  %v5555_v40 = vrot.slane %v1324_v36, 7 }
 0x1be   :  { %4331 = vmatpush3.bf16.msra.mxu1 %v4806_v55  ;;  %v4817_v55 = vld [vmem:[%s6247_s4 + $0x108] sm:$0xff]  }
 0x1bf   :  { %4332 = vmatprep.subr.bf16.mxu1 %v4807_v1 }
 0x1c2   :  { %4333 = vmatpush3.bf16.msra.mxu1 %v4807_v1  ;;  %v1312_v1 = vpop.permute.xlu0 %1311 }
 0x1c3   :  { %4338 = vmatprep.subr.bf16.mxu1 %v4808_v33  ;;  %v5542_v29 = vrot.slane %v1312_v1, 7  ;;  %v4826_v1 = vld [vmem:[%s6247_s4 + $0x150] sm:$0xff]  }
 0x1c5   :  { %4335 = vmatmul.mubr.bf16.vlgmr.msra.gmra.mrb[0].mxu1 %v862_v42  ;;  %v5549_v31 = vsel %vm1325_vm8, %v5542_v29, %v1327_v28  ;;  %v1338_v32 = vmul.f32 %v5542_v29, %v5336_v5  ;;  %v4821_v42 = vld [vmem:[%s6247_s4 + $0x128] sm:$0xff]  }
 0x1c6   :  { %4339 = vmatpush3.bf16.msra.mxu1 %v4808_v33  ;;  %4354 = vmatprep.mubr.bf16.mxu1 %v1042_v43  ;;  %v1339_v33 = vmul.f32 %v5549_v31, %v5328_v34  ;;  %v1320_v37 = vpop.permute.xlu0 %1319 }
 0x1c7   :  { %4340 = vmatprep.subr.bf16.mxu1 %v4809_v41 }
 0x1c8   :  { %v1343_v43 = vpack.c.bf16 %v1339_v33, %v1338_v32 }
 0x1ca   :  { %4341 = vmatpush3.bf16.msra.mxu1 %v4809_v41  ;;  %v1329_v41 = vrot.slane %v1320_v37, 7  ;;  %v1367_v49 = vshll.u32 %v1343_v43, 16 }
 0x1cb   :  { %4342 = vmatprep.subr.bf16.mxu1 %v4810_v44 }
 0x1cc   :  { %v1369_v57 = vrot.slane %v1367_v49, 1 }
 0x1ce   :  { %4343 = vmatpush3.bf16.msra.mxu1 %v4810_v44  ;;  %v5561_v44 = vsel %vm1325_vm8, %v1327_v28, %v1329_v41 }
 0x1cf   :  { %4344 = vmatprep.subr.bf16.mxu1 %v4811_v45 }
 0x1d2   :  { %4345 = vmatpush3.bf16.msra.mxu1 %v4811_v45  ;;  %v5565_v45 = vsel %vm1325_vm8, %v1329_v41, %v5555_v40  ;;  %v4828_v41 = vld [vmem:[%s6247_s4 + $0x160] sm:$0xff]  }
 0x1d3   :  { %4346 = vmatprep.subr.bf16.mxu1 %v4812_v38  ;;  %v1341_v46 = vmul.f32 %v5565_v45, %v5331_v39 }
 0x1d6   :  { %4347 = vmatpush3.bf16.msra.mxu1 %v4812_v38  ;;  %v1340_v38 = vmul.f32 %v5561_v44, %v5334_v60 }
 0x1d7   :  { %4348 = vmatprep.subr.bf16.mxu1 %v4813_v47 }
 0x1da   :  { %4349 = vmatpush3.bf16.msra.mxu1 %v4813_v47  ;;  %v4822_v47 = vld [vmem:[%s6247_s4 + $0x130] sm:$0xff]  }
 0x1db   :  { %4350 = vmatprep.subr.bf16.mxu1 %v4814_v50 }
 0x1de   :  { %4351 = vmatpush3.bf16.msra.mxu1 %v4814_v50  ;;  %v5574_v50 = vpack.c.bf16 %v1341_v46, %v1340_v38 }
 0x1df   :  { %4352 = vmatprep.subr.bf16.mxu1 %v4815_v10 }
 0x1e0   :  { %v1372_v12 = vshll.u32 %v5574_v50, 16 }
 0x1e2   :  { %4353 = vmatpush3.bf16.msra.mxu1 %v4815_v10  ;;  %v1183_v10 = vmul.f32 %v5532_v18, %v5331_v39 }
 0x1e3   :  { %4358 = vmatprep.subr.bf16.mxu1 %v4816_v13 }
 0x1e4   :  { %v1185_v23 = vpack.c.bf16 %v1183_v10, %v1182_v59 }
 0x1e5   :  { %4355 = vmatmul.mubr.bf16.vlgmr.msra.gmra.mrb[0].mxu1 %v1051_v8  ;;  %v1499_v8 = vpop.permute.xlu1 %1498 }
 0x1e6   :  { %4359 = vmatpush3.bf16.msra.mxu1 %v4816_v13  ;;  %4374 = vmatprep.mubr.bf16.mxu1 %v1184_v21  ;;  %v1365_v13 = vshrl.u32 %v1343_v43, 16  ;;  %v4825_v21 = vld [vmem:[%s6247_s4 + $0x148] sm:$0xff]   ;;  %v1509_v32 = vrot.slane %v1499_v8, 5 }
 0x1e7   :  { %4360 = vmatprep.subr.bf16.mxu1 %v4817_v55 }
 0x1e8   :  { %v1370_v16 = vor.u32 %v1369_v57, %v1365_v13  ;;  %v4829_v57 = vld [vmem:[%s6247_s4 + $0x168] sm:$0xff]   ;;  %v4830_v13 = vld [vmem:[%s6247_s4 + $0x170] sm:$0xff]  }
 0x1ea   :  { %4361 = vmatpush3.bf16.msra.mxu1 %v4817_v55  ;;  %v1374_v55 = vrot.slane %v1372_v12, 1 }
 0x1eb   :  { %4362 = vmatprep.subr.bf16.mxu1 %v4818_v56 }
 0x1ec   :  { %v1375_v25 = vsel %vm1363_vm9, %v1370_v16, %v1374_v55 }
 0x1ee   :  { %4363 = vmatpush3.bf16.msra.mxu1 %v4818_v56  ;;  %v1495_v56 = vpop.permute.xlu0 %1494 }
 0x1ef   :  { %4364 = vmatprep.subr.bf16.mxu1 %v4819_v27  ;;  %v5597_v33 = vrot.slane %v1495_v56, 5  ;;  %v4831_v56 = vld [vmem:[%s6247_s4 + $0x178] sm:$0xff]  }
 0x1f1   :  { %v1520_v46 = vmul.f32 %v5597_v33, %v5336_v5 }
 0x1f2   :  { %4365 = vmatpush3.bf16.msra.mxu1 %v4819_v27  ;;  %v1507_v27 = vpop.permute.xlu1 %1506  ;;  %v1503_v28 = vpop.permute.xlu0 %1502 }
 0x1f3   :  { %4366 = vmatprep.subr.bf16.mxu1 %v4820_v30  ;;  %v5599_v36 = vrot.slane %v1507_v27, 5  ;;  %v1511_v37 = vrot.slane %v1503_v28, 5 }
 0x1f5   :  { %v5609_v43 = vsel %vm447_vm0, %v1509_v32, %v1511_v37  ;;  %v5613_v38 = vsel %vm447_vm0, %v1511_v37, %v5599_v36  ;;  %v4832_v37 = vld [vmem:[%s6247_s4 + $0x180] sm:$0xff]  }
 0x1f6   :  { %4367 = vmatpush3.bf16.msra.mxu1 %v4820_v30  ;;  %v4827_v30 = vld [vmem:[%s6247_s4 + $0x158] sm:$0xff]   ;;  %v1522_v49 = vmul.f32 %v5609_v43, %v5334_v60 }
 0x1f7   :  { %4368 = vmatprep.subr.bf16.mxu1 %v4821_v42 }
 0x1fa   :  { %4369 = vmatpush3.bf16.msra.mxu1 %v4821_v42  ;;  %v5606_v42 = vsel %vm447_vm0, %v5597_v33, %v1509_v32  ;;  %v1376_v32 = vshrl.u32 %v5574_v50, 16 }
 0x1fb   :  { %4370 = vmatprep.subr.bf16.mxu1 %v4822_v47 }
 0x1fe   :  { %4371 = vmatpush3.bf16.msra.mxu1 %v4822_v47  ;;  %v1521_v47 = vmul.f32 %v5606_v42, %v5328_v34 }
 0x1ff   :  { %4372 = vmatprep.subr.bf16.mxu1 %v4823_v54 }
 0x200   :  { %v1525_v10 = vpack.c.bf16 %v1521_v47, %v1520_v46 }
 0x202   :  { %4373 = vmatpush3.bf16.msra.mxu1 %v4823_v54  ;;  %v1523_v54 = vmul.f32 %v5613_v38, %v5331_v39  ;;  %v1546_v12 = vshrl.u32 %v1525_v10, 16  ;;  %v1549_v16 = vshll.u32 %v1525_v10, 16  ;;  %v4835_v10 = vld [vmem:[%s6247_s4 + $0x198] sm:$0xff]  }
 0x203   :  { %4378 = vmatprep.subr.bf16.mxu1 %v4824_v24 }
 0x204   :  { %v1526_v59 = vpack.c.bf16 %v1523_v54, %v1522_v49  ;;  %v4833_v54 = vld [vmem:[%s6247_s4 + $0x188] sm:$0xff]  }
 0x205   :  { %4375 = vmatmul.mubr.bf16.vlgmr.msra.gmra.mrb[0].mxu1 %v1185_v23 }
 0x206   :  { %4379 = vmatpush3.bf16.msra.mxu1 %v4824_v24  ;;  %4394 = vmatprep.mubr.bf16.mxu1 %v1375_v25  ;;  %v1342_v24 = vmul.f32 %v5555_v40, %v5336_v5  ;;  %v1554_v23 = vshrl.u32 %v1526_v59, 16  ;;  %v1548_v25 = vrot.slane %v1546_v12, 1  ;;  %v1524_v12 = vmul.f32 %v5599_v36, %v5336_v5 }
 0x207   :  { %4380 = vmatprep.subr.bf16.mxu1 %v4825_v21 }
 0x208   :  { %v1345_v8 = vpack.c.bf16 %v1342_v24, %v1342_v24  ;;  %v1556_v27 = vrot.slane %v1554_v23, 1  ;;  %v1682_v24 = vpop.permute.xlu0 %1681 }
 0x209   :  { %v5654_v23 = vrot.slane %v1682_v24, 4 }
 0x20a   :  { %4381 = vmatpush3.bf16.msra.mxu1 %v4825_v21  ;;  %v1557_v21 = vshll.u32 %v1526_v59, 16  ;;  %v1686_v59 = vpop.permute.xlu1 %1685 }
 0x20b   :  { %4382 = vmatprep.subr.bf16.mxu1 %v4826_v1 }
 0x20c   :  { %v1559_v28 = vrot.slane %v1557_v21, 2 }
 0x20e   :  { %4383 = vmatpush3.bf16.msra.mxu1 %v4826_v1  ;;  %v1551_v1 = vrot.slane %v1549_v16, 2  ;;  %v1560_v47 = vor.u32 %v1559_v28, %v1556_v27  ;;  %v1696_v16 = vrot.slane %v1686_v59, 4  ;;  %v1694_v21 = vpop.permute.xlu1 %1693 }
 0x20f   :  { %4384 = vmatprep.subr.bf16.mxu1 %v4827_v30 }
 0x210   :  { %v1552_v46 = vor.u32 %v1551_v1, %v1548_v25  ;;  %v1527_v25 = vpack.c.bf16 %v1524_v12, %v1524_v12  ;;  %v5659_v1 = vrot.slane %v1694_v21, 4  ;;  %v5663_v28 = vsel %vm505_vm1, %v5654_v23, %v1696_v16  ;;  %v4840_v12 = vld [vmem:[%s6247_s4 + $0x1c0] sm:$0xff]  }
 0x212   :  { %4385 = vmatpush3.bf16.msra.mxu1 %v4827_v30  ;;  %v1380_v30 = vshll.u32 %v1345_v8, 16  ;;  %v1561_v50 = vsel %vm651_vm3, %v1552_v46, %v1560_v47  ;;  %v1690_v8 = vpop.permute.xlu0 %1689  ;;  %6273 = vst [vmem:[#allocation9_spill] sm:$0xff] %v5659_v1 }
 0x213   :  { %4386 = vmatprep.subr.bf16.mxu1 %v4828_v41  ;;  %v1698_v27 = vrot.slane %v1690_v8, 4 }
 0x214   :  { %v1382_v49 = vrot.slane %v1380_v30, 1  ;;  %v4838_v30 = vld [vmem:[%s6247_s4 + $0x1b0] sm:$0xff]  }
 0x215   :  { %v5673_v46 = vsel %vm505_vm1, %v1698_v27, %v5659_v1 }
 0x216   :  { %4387 = vmatpush3.bf16.msra.mxu1 %v4828_v41  ;;  %v1378_v41 = vor.u32 %v1376_v32, %v1374_v55  ;;  %v4834_v55 = vld [vmem:[%s6247_s4 + $0x190] sm:$0xff]   ;;  %v1563_v32 = vshrl.u32 %v1527_v25, 16  ;;  %6275 = vst [vmem:[#allocation11_spill] sm:$0xff] %v5673_v46 }
 0x217   :  { %4388 = vmatprep.subr.bf16.mxu1 %v4829_v57 }
 0x21a   :  { %4389 = vmatpush3.bf16.msra.mxu1 %v4829_v57  ;;  %v1383_v57 = vsel %vm1363_vm9, %v1378_v41, %v1382_v49  ;;  %v5669_v41 = vsel %vm505_vm1, %v1696_v16, %v1698_v27  ;;  %v1707_v49 = vmul.f32 %v5654_v23, %v5336_v5  ;;  %v4841_v27 = vld [vmem:[%s6247_s4 + $0x1c8] sm:$0xff]  }
 0x21b   :  { %4390 = vmatprep.subr.bf16.mxu1 %v4830_v13  ;;  %6274 = vst [vmem:[#allocation10_spill] sm:$0xff] %v5669_v41 }
 0x21e   :  { %4391 = vmatpush3.bf16.msra.mxu1 %v4830_v13  ;;  %v4836_v13 = vld [vmem:[%s6247_s4 + $0x1a0] sm:$0xff]  }
 0x21f   :  { %4392 = vmatprep.subr.bf16.mxu1 %v4831_v56 }
 0x222   :  { %4393 = vmatpush3.bf16.msra.mxu1 %v4831_v56  ;;  %v4837_v56 = vld [vmem:[%s6247_s4 + $0x1a8] sm:$0xff]  }
 0x223   :  { %4398 = vmatprep.subr.bf16.mxu1 %v4832_v37 }
 0x225   :  { %4395 = vmatmul.mubr.bf16.vlgmr.msra.gmra.mrb[0].mxu1 %v1383_v57  ;;  %v1709_v57 = vmul.f32 %v5669_v41, %v5334_v60 }
 0x226   :  { %4399 = vmatpush3.bf16.msra.mxu1 %v4832_v37  ;;  %4414 = vmatprep.mubr.bf16.mxu1 %v1561_v50  ;;  %v1566_v37 = vshll.u32 %v1527_v25, 16  ;;  %v1710_v50 = vmul.f32 %v5673_v46, %v5331_v39  ;;  %v1851_v25 = vpop.permute.xlu0 %1850 }
 0x227   :  { %4400 = vmatprep.subr.bf16.mxu1 %v4833_v54 }
 0x228   :  { %v1568_v59 = vrot.slane %v1566_v37, 2  ;;  %v4842_v37 = vld [vmem:[%s6247_s4 + $0x1d0] sm:$0xff]  }
 0x22a   :  { %4401 = vmatpush3.bf16.msra.mxu1 %v4833_v54  ;;  %v1708_v54 = vmul.f32 %v5663_v28, %v5328_v34 }
 0x22b   :  { %4402 = vmatprep.subr.bf16.mxu1 %v4834_v55 }
 0x22c   :  { %v1712_v24 = vpack.c.bf16 %v1708_v54, %v1707_v49  ;;  %v1859_v54 = vpop.permute.xlu0 %1858 }
 0x22e   :  { %4403 = vmatpush3.bf16.msra.mxu1 %v4834_v55  ;;  %v4839_v55 = vld [vmem:[%s6247_s4 + $0x1b8] sm:$0xff]   ;;  %v1735_v21 = vrot.slane %v1712_v24, 2 }
 0x22f   :  { %4404 = vmatprep.subr.bf16.mxu1 %v4835_v10 }
 0x232   :  { %4405 = vmatpush3.bf16.msra.mxu1 %v4835_v10  ;;  %v1565_v10 = vrot.slane %v1563_v32, 1 }
 0x233   :  { %4406 = vmatprep.subr.bf16.mxu1 %v4836_v13 }
 0x234   :  { %v1569_v16 = vor.u32 %v1568_v59, %v1565_v10  ;;  %v1867_v10 = vrot.slane %v1859_v54, 3  ;;  %v4844_v59 = vld [vmem:[%s6247_s4 + $0x1e0] sm:$0xff]  }
 0x236   :  { %4407 = vmatpush3.bf16.msra.mxu1 %v4836_v13  ;;  %v1713_v13 = vpack.c.bf16 %v1710_v50, %v1709_v57  ;;  %v1570_v32 = vsel %vm651_vm3, %v1560_v47, %v1569_v16  ;;  %v4843_v57 = vld [vmem:[%s6247_s4 + $0x1d8] sm:$0xff]   ;;  %v5703_v50 = vrot.slane %v1851_v25, 3 }
 0x237   :  { %4408 = vmatprep.subr.bf16.mxu1 %v4837_v56 }
 0x238   :  { %v5689_v8 = vrot.slane %v1713_v13, 2  ;;  %6276 = vst [vmem:[#allocation12_spill] sm:$0xff] %v5703_v50  ;;  %v1876_v16 = vmul.f32 %v5703_v50, %v5336_v5 }
 0x23a   :  { %4409 = vmatpush3.bf16.msra.mxu1 %v4837_v56  ;;  %v1855_v56 = vpop.permute.xlu1 %1854 }
 0x23b   :  { %4410 = vmatprep.subr.bf16.mxu1 %v4838_v30  ;;  %v1865_v47 = vrot.slane %v1855_v56, 3 }
 0x23d   :  { %v5712_v24 = vsel %vm798_vm4, %v5703_v50, %v1865_v47  ;;  %v5715_v13 = vsel %vm798_vm4, %v1865_v47, %v1867_v10 }
 0x23e   :  { %4411 = vmatpush3.bf16.msra.mxu1 %v4838_v30  ;;  %v1737_v30 = vsel %vm546_vm2, %v1735_v21, %v5689_v8  ;;  %v1863_v49 = vpop.permute.xlu1 %1862  ;;  %6278 = vst [vmem:[#allocation14_spill] sm:$0xff] %v5712_v24  ;;  %6279 = vst [vmem:[#allocation15_spill] sm:$0xff] %v5715_v13  ;;  %v1877_v21 = vmul.f32 %v5712_v24, %v5328_v34  ;;  %v1878_v56 = vmul.f32 %v5715_v13, %v5334_v60  ;;  %v4848_v60 = vld [vmem:[%s6247_s4 + $0x200] sm:$0xff]  }
 0x23f   :  { %4412 = vmatprep.subr.bf16.mxu1 %v4839_v55 }
 0x242   :  { %4413 = vmatpush3.bf16.msra.mxu1 %v4839_v55  ;;  %v5705_v55 = vrot.slane %v1863_v49, 3  ;;  %v1711_v49 = vmul.f32 %v5659_v1, %v5336_v5 }
 0x243   :  { %4418 = vmatprep.subr.bf16.mxu1 %v4840_v12 }
 0x244   :  { %6277 = vst [vmem:[#allocation13_spill] sm:$0xff] %v5705_v55 }
 0x245   :  { %4415 = vmatmul.mubr.bf16.vlgmr.msra.gmra.mrb[0].mxu1 %v1570_v32  ;;  %v1881_v32 = vpack.c.bf16 %v1877_v21, %v1876_v16  ;;  %v4847_v16 = vld [vmem:[%s6247_s4 + $0x1f8] sm:$0xff]   ;;  %v1714_v21 = vpack.c.bf16 %v1711_v49, %v1711_v49 }
 0x246   :  { %4419 = vmatpush3.bf16.msra.mxu1 %v4840_v12  ;;  %4434 = vmatprep.mubr.bf16.mxu1 %v1737_v30  ;;  %v5719_v12 = vsel %vm798_vm4, %v1867_v10, %v5705_v55 }
 0x247   :  { %4420 = vmatprep.subr.bf16.mxu1 %v4841_v27  ;;  %6280 = vst [vmem:[#allocation16_spill] sm:$0xff] %v5719_v12  ;;  %v1879_v25 = vmul.f32 %v5719_v12, %v5331_v39  ;;  %v1902_v54 = vshrl.u32 %v1881_v32, 16  ;;  %v1905_v47 = vshll.u32 %v1881_v32, 16  ;;  %v1738_v32 = vrot.slane %v1714_v21, 2  ;;  %v4855_v21 = vld [vmem:[%s6247_s4 + $0x238] sm:$0xff]  }
 0x249   :  { %v1882_v30 = vpack.c.bf16 %v1879_v25, %v1878_v56  ;;  %v1907_v56 = vrot.slane %v1905_v47, 3  ;;  %v1739_v49 = vsel %vm546_vm2, %v5689_v8, %v1738_v32  ;;  %v4852_v8 = vld [vmem:[%s6247_s4 + $0x220] sm:$0xff]  }
 0x24a   :  { %4421 = vmatpush3.bf16.msra.mxu1 %v4841_v27  ;;  %v4845_v27 = vld [vmem:[%s6247_s4 + $0x1e8] sm:$0xff]  }
 0x24b   :  { %4422 = vmatprep.subr.bf16.mxu1 %v4842_v37  ;;  %v1910_v10 = vshrl.u32 %v1882_v30, 16 }
 0x24d   :  { %v1912_v25 = vrot.slane %v1910_v10, 2  ;;  %v4854_v10 = vld [vmem:[%s6247_s4 + $0x230] sm:$0xff]  }
 0x24e   :  { %4423 = vmatpush3.bf16.msra.mxu1 %v4842_v37  ;;  %v4846_v37 = vld [vmem:[%s6247_s4 + $0x1f0] sm:$0xff]  }
 0x24f   :  { %4424 = vmatprep.subr.bf16.mxu1 %v4843_v57 }
 0x252   :  { %4425 = vmatpush3.bf16.msra.mxu1 %v4843_v57  ;;  %v1913_v57 = vshll.u32 %v1882_v30, 16 }
 0x253   :  { %4426 = vmatprep.subr.bf16.mxu1 %v4844_v59 }
 0x254   :  { %v1915_v39 = vrot.slane %v1913_v57, 3 }
 0x256   :  { %4427 = vmatpush3.bf16.msra.mxu1 %v4844_v59  ;;  %v1904_v59 = vrot.slane %v1902_v54, 2  ;;  %v1916_v30 = vor.u32 %v1915_v39, %v1912_v25  ;;  %v4850_v54 = vld [vmem:[%s6247_s4 + $0x210] sm:$0xff]   ;;  %v4851_v39 = vld [vmem:[%s6247_s4 + $0x218] sm:$0xff]  }
 0x257   :  { %4428 = vmatprep.subr.bf16.mxu1 %v4845_v27 }
 0x258   :  { %v1908_v34 = vor.u32 %v1907_v56, %v1904_v59 }
 0x25a   :  { %4429 = vmatpush3.bf16.msra.mxu1 %v4845_v27  ;;  %v4849_v27 = vld [vmem:[%s6247_s4 + $0x208] sm:$0xff]  }
 0x25b   :  { %4430 = vmatprep.subr.bf16.mxu1 %v4846_v37 }
 0x25e   :  { %4431 = vmatpush3.bf16.msra.mxu1 %v4846_v37  ;;  %v1917_v37 = vsel %vm836_vm5, %v1908_v34, %v1916_v30  ;;  %v1880_v34 = vmul.f32 %v5705_v55, %v5336_v5 }
 0x25f   :  { %4432 = vmatprep.subr.bf16.mxu1 %v4847_v16 }
 0x260   :  { %v1883_v47 = vpack.c.bf16 %v1880_v34, %v1880_v34  ;;  %v4863_v34 = vld [vmem:[%s6250_s7 + $0x78] sm:$0xff]  }
 0x262   :  { %4433 = vmatpush3.bf16.msra.mxu1 %v4847_v16  ;;  %v1919_v57 = vshrl.u32 %v1883_v47, 16  ;;  %v1922_v16 = vshll.u32 %v1883_v47, 16 }
 0x263   :  { %4438 = vmatprep.subr.bf16.mxu1 %v4848_v60 }
 0x264   :  { %v1921_v59 = vrot.slane %v1919_v57, 2  ;;  %v1924_v56 = vrot.slane %v1922_v16, 3 }
 0x265   :  { %4435 = vmatmul.mubr.bf16.vlgmr.msra.gmra.mrb[0].mxu1 %v1739_v49  ;;  %v4857_v49 = vld [vmem:[%s6250_s7 + $0x48] sm:$0xff]  }
 0x266   :  { %4439 = vmatpush3.bf16.msra.mxu1 %v4848_v60  ;;  %4454 = vmatprep.mubr.bf16.mxu1 %v1917_v37  ;;  %v4853_v60 = vld [vmem:[%s6247_s4 + $0x228] sm:$0xff]   ;;  %v1925_v25 = vor.u32 %v1924_v56, %v1921_v59  ;;  %v4858_v37 = vld [vmem:[%s6250_s7 + $0x50] sm:$0xff]  }
 0x267   :  { %4440 = vmatprep.subr.bf16.mxu1 %v4849_v27 }
 0x268   :  { %v1926_v32 = vsel %vm836_vm5, %v1916_v30, %v1925_v25  ;;  %v4859_v30 = vld [vmem:[%s6250_s7 + $0x58] sm:$0xff]  }
 0x26a   :  { %4441 = vmatpush3.bf16.msra.mxu1 %v4849_v27  ;;  %v4856_v27 = vld [vmem:[%s6250_s7 + $0x40] sm:$0xff]  }
 0x26b   :  { %4442 = vmatprep.subr.bf16.mxu1 %v4850_v54  ;;  %4458 = vmatprep.subr.bf16.mxu0 %v4856_v27 }
 0x26c   :  { %4459 = vmatpush3.bf16.msra.mxu0 %v4856_v27 }
 0x26d   :  { %4460 = vmatprep.subr.bf16.mxu0 %v4857_v49 }
 0x26e   :  { %4443 = vmatpush3.bf16.msra.mxu1 %v4850_v54  ;;  %v4860_v54 = vld [vmem:[%s6250_s7 + $0x60] sm:$0xff]  }
 0x26f   :  { %4444 = vmatprep.subr.bf16.mxu1 %v4851_v39 }
 0x270   :  { %4461 = vmatpush3.bf16.msra.mxu0 %v4857_v49 }
 0x271   :  { %4462 = vmatprep.subr.bf16.mxu0 %v4858_v37 }
 0x272   :  { %4445 = vmatpush3.bf16.msra.mxu1 %v4851_v39  ;;  %v4861_v39 = vld [vmem:[%s6250_s7 + $0x68] sm:$0xff]  }
 0x273   :  { %4446 = vmatprep.subr.bf16.mxu1 %v4852_v8 }
 0x274   :  { %4463 = vmatpush3.bf16.msra.mxu0 %v4858_v37 }
 0x275   :  { %4464 = vmatprep.subr.bf16.mxu0 %v4859_v30 }
 0x276   :  { %4447 = vmatpush3.bf16.msra.mxu1 %v4852_v8  ;;  %v4862_v8 = vld [vmem:[%s6250_s7 + $0x70] sm:$0xff]  }
 0x277   :  { %4448 = vmatprep.subr.bf16.mxu1 %v4853_v60 }
 0x278   :  { %4465 = vmatpush3.bf16.msra.mxu0 %v4859_v30 }
 0x279   :  { %4466 = vmatprep.subr.bf16.mxu0 %v4860_v54 }
 0x27a   :  { %4449 = vmatpush3.bf16.msra.mxu1 %v4853_v60  ;;  %v5797_v60 = vld [vmem:[%s6250_s7] sm:$0xff]  }
 0x27b   :  { %4450 = vmatprep.subr.bf16.mxu1 %v4854_v10 }
 0x27c   :  { %4467 = vmatpush3.bf16.msra.mxu0 %v4860_v54 }
 0x27d   :  { %4468 = vmatprep.subr.bf16.mxu0 %v4861_v39 }
 0x27e   :  { %4451 = vmatpush3.bf16.msra.mxu1 %v4854_v10 }
 0x27f   :  { %4452 = vmatprep.subr.bf16.mxu1 %v4855_v21 }
 0x280   :  { %4469 = vmatpush3.bf16.msra.mxu0 %v4861_v39 }
 0x281   :  { %4470 = vmatprep.subr.bf16.mxu0 %v4862_v8 }
 0x282   :  { %4453 = vmatpush3.bf16.msra.mxu1 %v4855_v21 }
 0x284   :  { %4471 = vmatpush3.bf16.msra.mxu0 %v4862_v8 }
 0x285   :  { %4455 = vmatmul.mubr.bf16.vlgmr.msra.gmra.mrb[0].mxu1 %v1926_v32  ;;  %4472 = vmatprep.subr.bf16.mxu0 %v4863_v34 }
 0x288   :  { %4473 = vmatpush3.bf16.msra.mxu0 %v4863_v34 }
 0x289   :  { %4478 = vmatprep.subr.bf16.mxu0 %v5797_v60 }
 0x358   :  { %v4456_v47 = vpop.f32.mrb[0].mxu1 }
 0x359   :  { %v2011_v10 = vpop.f32.mrb[1].mxu1 }
 0x35a   :  { %v4457_v57 = vpop.f32.mrb[2].mxu1 }
 0x35b   :  { %v2014_v16 = vpop.f32.mrb[3].mxu1 }
 0x35c   :  { %v2032_v21 = vadd.f32 %v2014_v16, %v2011_v10 }
 0x35e   :  { %v2033_v59 = vadd.f32 %v4456_v47, %v2032_v21 }
 0x360   :  { %v2034_v56 = vadd.f32 %v4457_v57, %v2033_v59 }
 0x362   :  { %v2035_v25 = vrot.slane %v2034_v56, 4 }
 0x364   :  { %v2036_v32 = vadd.f32 %v2035_v25, %v2034_v56 }
 0x366   :  { %v2037_v27 = vrot.slane %v2036_v32, 2 }
 0x368   :  { %v2038_v49 = vadd.f32 %v2037_v27, %v2036_v32 }
 0x36a   :  { %v2039_v37 = vrot.slane %v2038_v49, 1 }
 0x36c   :  { %v2040_v30 = vadd.f32 %v2039_v37, %v2038_v49  ;;  %v2030_v37 = vld [vmem:[%s6248_s5] sm:$0x1] }
 0x36e   :  { %v2042_v54 = vmul.f32 0.03125, %v2040_v30 }
 0x370   :  { %v2043_v39 = vsub.f32 %v2011_v10, %v2042_v54  ;;  %v2044_v8 = vsub.f32 %v2014_v16, %v2042_v54  ;;  %v2045_v5 = vsub.f32 %v4456_v47, %v2042_v54  ;;  %v2046_v34 = vsub.f32 %v4457_v57, %v2042_v54 }
 0x372   :  { %v2047_v55 = vmul.f32 %v2043_v39, %v2043_v39  ;;  %v2048_v12 = vmul.f32 %v2044_v8, %v2044_v8  ;;  %v2049_v13 = vmul.f32 %v2045_v5, %v2045_v5  ;;  %v2050_v50 = vmul.f32 %v2046_v34, %v2046_v34  ;;  %v2031_v5 = vld [vmem:[%s6249_s6] sm:$0x1] }
 0x374   :  { %v2051_v24 = vadd.f32 %v2048_v12, %v2047_v55 }
 0x376   :  { %v2052_v1 = vadd.f32 %v2051_v24, %v2049_v13 }
 0x378   :  { %v2053_v46 = vadd.f32 %v2052_v1, %v2050_v50 }
 0x37a   :  { %v2054_v21 = vrot.slane %v2053_v46, 4 }
 0x37c   :  { %v2055_v59 = vadd.f32 %v2054_v21, %v2053_v46 }
 0x37e   :  { %v2056_v41 = vrot.slane %v2055_v59, 2 }
 0x380   :  { %v2057_v56 = vadd.f32 %v2056_v41, %v2055_v59 }
 0x382   :  { %v2058_v25 = vrot.slane %v2057_v56, 1 }
 0x384   :  { %v2059_v32 = vadd.f32 %v2058_v25, %v2057_v56 }
 0x386   :  { %v2060_v27 = vmul.f32 0.03125, %v2059_v32 }
 0x388   :  { %v2061_v49 = vadd.f32 1e-05, %v2060_v27 }
 0x38a   :  { %4930 = vrsqrt.f32 %v2061_v49 }
 0x394   :  { %v4931_v30 = vpop.eup %4930 }
 0x395   :  { %v2063_v39 = vmul.f32 %v4931_v30, %v2030_v37 }
 0x397   :  { %v2064_v1 = vmul.f32 %v2063_v39, %v2042_v54  ;;  %v2070_v46 = vrot.slane %v2063_v39, %v5304_v48 }
 0x399   :  { %v2065_v50 = vsub.f32 %v2031_v5, %v2064_v1  ;;  %v2072_v41 = vmul.f32 %v2070_v46, %v2011_v10  ;;  %v2073_v55 = vmul.f32 %v2070_v46, %v2014_v16  ;;  %v2074_v24 = vmul.f32 %v4456_v47, %v2070_v46 }
 0x39a   :  { %v2075_v13 = vmul.f32 %v4457_v57, %v2070_v46 }
 0x39b   :  { %v2080_v12 = vrot.slane %v2065_v50, %v5304_v48 }
 0x39d   :  { %v2082_v8 = vadd.f32 %v2080_v12, %v2072_v41  ;;  %v2083_v34 = vadd.f32 %v2080_v12, %v2073_v55  ;;  %v2084_v21 = vadd.f32 %v2080_v12, %v2074_v24  ;;  %v2085_v59 = vadd.f32 %v2080_v12, %v2075_v13  ;;  %v4865_v24 = vld [vmem:[%s6250_s7 + $0x8] sm:$0xff]  }
 0x39f   :  { %v5808_v56 = vmax.f32 %v2082_v8, 0.0  ;;  %v5810_v25 = vmax.f32 %v2083_v34, 0.0  ;;  %v5812_v32 = vmax.f32 %v2084_v21, 0.0  ;;  %v5814_v54 = vmax.f32 %v2085_v59, 0.0 }
 0x3a1   :  { %v2114_v10 = vmul.f32 %v5814_v54, %v5342_v4  ;;  %v2115_v47 = vmul.f32 %v5808_v56, %v5370_v17  ;;  %v2116_v57 = vmul.f32 %v5810_v25, %v5379_v63  ;;  %v2117_v16 = vmul.f32 %v5812_v32, %v5376_v19 }
 0x3a2   :  { %v2118_v27 = vmul.f32 %v5814_v54, %v5344_v14  ;;  %v2090_v49 = vmul.f32 %v5814_v54, %v5338_v35  ;;  %v2091_v37 = vmul.f32 %v5808_v56, %v5349_v9  ;;  %v2092_v4 = vmul.f32 %v5810_v25, %v5352_v3 }
 0x3a3   :  { %v2119_v30 = vpack.c.bf16 %v2115_v47, %v2114_v10  ;;  %v2120_v17 = vpack.c.bf16 %v2117_v16, %v2116_v57  ;;  %v2093_v63 = vmul.f32 %v5812_v32, %v5362_v15  ;;  %v2094_v19 = vmul.f32 %v5814_v54, %v5340_v6 }
 0x3a4   :  { %v2121_v39 = vpack.c.bf16 %v2118_v27, %v2118_v27  ;;  %v2095_v5 = vpack.c.bf16 %v2091_v37, %v2090_v49  ;;  %v2371_v14 = vmul.f32 %v5814_v54, %v5400_v61  ;;  %v2372_v35 = vmul.f32 %v5808_v56, %v5411_v20 }
 0x3a5   :  { %v2142_v9 = vrot.slane %v2119_v30, 2  ;;  %v2143_v1 = vrot.slane %v2120_v17, 2  ;;  %v2096_v46 = vpack.c.bf16 %v2093_v63, %v2092_v4  ;;  %v2097_v3 = vpack.c.bf16 %v2094_v19, %v2094_v19  ;;  %v4866_v4 = vld [vmem:[%s6250_s7 + $0x10] sm:$0xff]  }
 0x3a6   :  { %v2145_v50 = vrot.slane %v2121_v39, 2  ;;  %v2247_v41 = vshrl.u32 %v2095_v5, 16  ;;  %v2250_v55 = vshll.u32 %v2095_v5, 16  ;;  %v2373_v15 = vmul.f32 %v5810_v25, %v5414_v53 }
 0x3a7   :  { %v2144_v6 = vsel %vm546_vm2, %v2142_v9, %v2143_v1  ;;  %v2255_v61 = vshrl.u32 %v2096_v46, 16  ;;  %v2258_v13 = vshll.u32 %v2096_v46, 16  ;;  %v2264_v12 = vshrl.u32 %v2097_v3, 16 }
 0x3a8   :  { %4474 = vmatprep.mubr.bf16.mxu0 %v2144_v6  ;;  %v2146_v20 = vsel %vm546_vm2, %v2143_v1, %v2145_v50  ;;  %v2249_v8 = vrot.slane %v2247_v41, 1  ;;  %v2252_v34 = vrot.slane %v2250_v55, 2  ;;  %v2267_v21 = vshll.u32 %v2097_v3, 16 }
 0x3a9   :  { %4475 = vmatmul.mubr.bf16.vlgmr.msra.gmra.mrb[16].mxu0 %v2146_v20  ;;  %v2257_v59 = vrot.slane %v2255_v61, 1  ;;  %v2260_v10 = vrot.slane %v2258_v13, 2  ;;  %v2266_v47 = vrot.slane %v2264_v12, 1  ;;  %v2374_v53 = vmul.f32 %v5812_v32, %v5418_v7 }
 0x3aa   :  { %4479 = vmatpush3.bf16.msra.mxu0 %v5797_v60  ;;  %v2253_v57 = vor.u32 %v2252_v34, %v2249_v8  ;;  %v2269_v16 = vrot.slane %v2267_v21, 2  ;;  %v2376_v27 = vpack.c.bf16 %v2372_v35, %v2371_v14  ;;  %v2375_v49 = vmul.f32 %v5814_v54, %v5402_v26 }
 0x3ab   :  { %4480 = vmatprep.subr.bf16.mxu0 %v4865_v24  ;;  %v2261_v37 = vor.u32 %v2260_v10, %v2257_v59  ;;  %v2377_v30 = vpack.c.bf16 %v2374_v53, %v2373_v15  ;;  %v2525_v17 = vmul.f32 %v5814_v54, %v5454_v51  ;;  %v2526_v7 = vmul.f32 %v5808_v56, %v5464_v62  ;;  %v4867_v62 = vld [vmem:[%s6250_s7 + $0x18] sm:$0xff]  }
 0x3ac   :  { %v2270_v60 = vor.u32 %v2269_v16, %v2266_v47  ;;  %v2397_v63 = vshrl.u32 %v2376_v27, 16  ;;  %v2400_v19 = vshll.u32 %v2376_v27, 16  ;;  %v2378_v39 = vpack.c.bf16 %v2375_v49, %v2375_v49 }
 0x3ad   :  { %v2262_v5 = vsel %vm651_vm3, %v2253_v57, %v2261_v37  ;;  %v2405_v26 = vshrl.u32 %v2377_v30, 16  ;;  %v2408_v14 = vshll.u32 %v2377_v30, 16  ;;  %v2527_v35 = vmul.f32 %v5810_v25, %v5466_v0 }
 0x3ae   :  { %4494 = vmatprep.mubr.bf16.mxu0 %v2262_v5  ;;  %4481 = vmatpush3.bf16.msra.mxu0 %v4865_v24  ;;  %v5863_v9 = vsel %vm651_vm3, %v2261_v37, %v2270_v60  ;;  %v2399_v51 = vrot.slane %v2397_v63, 2  ;;  %v2402_v1 = vrot.slane %v2400_v19, 3  ;;  %v2414_v46 = vshrl.u32 %v2378_v39, 16  ;;  %v4869_v63 = vld [vmem:[%s6250_s7 + $0x28] sm:$0xff]  }
 0x3af   :  { %4482 = vmatprep.subr.bf16.mxu0 %v4866_v4  ;;  %v2407_v3 = vrot.slane %v2405_v26, 2  ;;  %v2410_v50 = vrot.slane %v2408_v14, 3  ;;  %v2417_v41 = vshll.u32 %v2378_v39, 16  ;;  %v2528_v55 = vmul.f32 %v5812_v32, %v5469_v2 }
 0x3b0   :  { %v2403_v0 = vor.u32 %v2402_v1, %v2399_v51  ;;  %v2416_v15 = vrot.slane %v2414_v46, 2  ;;  %v2530_v6 = vpack.c.bf16 %v2526_v7, %v2525_v17  ;;  %v2529_v24 = vmul.f32 %v5814_v54, %v5456_v52  ;;  %v4868_v52 = vld [vmem:[%s6250_s7 + $0x20] sm:$0xff]  }
 0x3b1   :  { %v2411_v61 = vor.u32 %v2410_v50, %v2407_v3  ;;  %v2419_v13 = vrot.slane %v2417_v41, 3  ;;  %v2531_v12 = vpack.c.bf16 %v2528_v55, %v2527_v35  ;;  %v5874_v20 = vmul.f32 %v5808_v56, %v5519_v11 }
 0x3b2   :  { %4483 = vmatpush3.bf16.msra.mxu0 %v4866_v4  ;;  %v2551_v8 = vshrl.u32 %v2530_v6, 16  ;;  %v2554_v34 = vshll.u32 %v2530_v6, 16  ;;  %v2532_v21 = vpack.c.bf16 %v2529_v24, %v2529_v24  ;;  %v5878_v2 = vmul.f32 %v5810_v25, %v5517_v58 }
 0x3b3   :  { %4484 = vmatprep.subr.bf16.mxu0 %v4867_v62  ;;  %v5884_v59 = vsel %vm836_vm5, %v2403_v0, %v2411_v61  ;;  %v2420_v10 = vor.u32 %v2419_v13, %v2416_v15  ;;  %v2559_v47 = vshrl.u32 %v2531_v12, 16  ;;  %v2562_v11 = vshll.u32 %v2531_v12, 16 }
 0x3b4   :  { %v2553_v53 = vrot.slane %v2551_v8, 3  ;;  %v2556_v57 = vrot.slane %v2554_v34, 4  ;;  %v2568_v16 = vshrl.u32 %v2532_v21, 16  ;;  %v2571_v27 = vshll.u32 %v2532_v21, 16 }
 0x3b5   :  { %v5887_v49 = vsel %vm836_vm5, %v2411_v61, %v2420_v10  ;;  %v2561_v58 = vrot.slane %v2559_v47, 3  ;;  %v2564_v37 = vrot.slane %v2562_v11, 4  ;;  %v2683_v4 = vpack.c.bf16 %v5878_v2, %v5874_v20  ;;  %v4893_v20 = vld [vmem:[%s6250_s7 + $0x128] sm:$0xff]   ;;  %v4894_v2 = vld [vmem:[%s6250_s7 + $0x130] sm:$0xff]  }
 0x3b6   :  { %4485 = vmatpush3.bf16.msra.mxu0 %v4867_v62  ;;  %v2557_v30 = vor.u32 %v2556_v57, %v2553_v53  ;;  %v2570_v17 = vrot.slane %v2568_v16, 3  ;;  %v2573_v7 = vrot.slane %v2571_v27, 4  ;;  %v5893_v60 = vmul.f32 %v5812_v32, %v5534_v22 }
 0x3b7   :  { %4486 = vmatprep.subr.bf16.mxu0 %v4868_v52  ;;  %v2565_v19 = vor.u32 %v2564_v37, %v2561_v58  ;;  %v5900_v39 = vmul.f32 %v5814_v54, %v5532_v18  ;;  %v2803_v5 = vmul.f32 %v5808_v56, %v5542_v29  ;;  %v2804_v26 = vmul.f32 %v5810_v25, %v5549_v31 }
 0x3b8   :  { %v2574_v14 = vor.u32 %v2573_v7, %v2570_v17  ;;  %v2805_v22 = vmul.f32 %v5812_v32, %v5561_v44  ;;  %v2806_v35 = vmul.f32 %v5814_v54, %v5565_v45  ;;  %v2807_v51 = vmul.f32 %v5808_v56, %v5555_v40  ;;  %v4870_v40 = vld [vmem:[%s6250_s7 + $0x30] sm:$0xff]  }
 0x3b9   :  { %v5913_v1 = vsel %vm1025_vm7, %v2557_v30, %v2565_v19  ;;  %v2684_v18 = vpack.c.bf16 %v5900_v39, %v5893_v60  ;;  %v2808_v29 = vpack.c.bf16 %v2804_v26, %v2803_v5  ;;  %v2951_v31 = vmul.f32 %v5808_v56, %v5597_v33  ;;  %v6281_v7 = vld [vmem:[#allocation10_spill] sm:$0xff]  ;;  %v6282_v26 = vld [vmem:[#allocation11_spill] sm:$0xff]  ;;  %v4900_v60 = vld [vmem:[%s6250_s7 + $0x160] sm:$0xff]  }
 0x3ba   :  { %4487 = vmatpush3.bf16.msra.mxu0 %v4868_v52  ;;  %v5920_v46 = vsel %vm1025_vm7, %v2565_v19, %v2574_v14  ;;  %v2809_v44 = vpack.c.bf16 %v2806_v35, %v2805_v22  ;;  %v2810_v62 = vpack.c.bf16 %v2807_v51, %v2807_v51  ;;  %v2952_v45 = vmul.f32 %v5810_v25, %v5606_v42  ;;  %v6283_v51 = vld [vmem:[#allocation9_spill] sm:$0xff] }
 0x3bb   :  { %4488 = vmatprep.subr.bf16.mxu0 %v4869_v63  ;;  %v2829_v3 = vshrl.u32 %v2808_v29, 16  ;;  %v2831_v50 = vshll.u32 %v2808_v29, 16  ;;  %v2953_v41 = vmul.f32 %v5812_v32, %v5609_v43  ;;  %v2954_v33 = vmul.f32 %v5814_v54, %v5613_v38  ;;  %v4871_v38 = vld [vmem:[%s6250_s7 + $0x38] sm:$0xff]   ;;  %v4901_v39 = vld [vmem:[%s6250_s7 + $0x168] sm:$0xff]  }
 0x3bc   :  { %v2836_v55 = vshll.u32 %v2809_v44, 16  ;;  %v2840_v0 = vshrl.u32 %v2809_v44, 16  ;;  %v2844_v15 = vshll.u32 %v2810_v62, 16  ;;  %v2956_v6 = vpack.c.bf16 %v2952_v45, %v2951_v31  ;;  %v6284_v31 = vld [vmem:[#allocation12_spill] sm:$0xff]  ;;  %v6285_v62 = vld [vmem:[#allocation14_spill] sm:$0xff] }
 0x3bd   :  { %v2833_v24 = vrot.slane %v2831_v50, 1  ;;  %v2957_v61 = vpack.c.bf16 %v2954_v33, %v2953_v41  ;;  %v2955_v42 = vmul.f32 %v5808_v56, %v5599_v36  ;;  %v3105_v13 = vmul.f32 %v5808_v56, %v5654_v23  ;;  %v6286_v41 = vld [vmem:[#allocation15_spill] sm:$0xff] }
 0x3be   :  { %4489 = vmatpush3.bf16.msra.mxu0 %v4869_v63  ;;  %v2838_v12 = vrot.slane %v2836_v55, 1  ;;  %v2846_v8 = vrot.slane %v2844_v15, 1  ;;  %v2977_v34 = vshrl.u32 %v2956_v6, 16  ;;  %v2980_v43 = vshll.u32 %v2956_v6, 16  ;;  %v6287_v15 = vld [vmem:[#allocation16_spill] sm:$0xff] }
 0x3bf   :  { %4490 = vmatprep.subr.bf16.mxu0 %v4870_v40  ;;  %v2834_v21 = vor.u32 %v2833_v24, %v2829_v3  ;;  %v2985_v52 = vshrl.u32 %v2957_v61, 16  ;;  %v2988_v10 = vshll.u32 %v2957_v61, 16  ;;  %v2958_v47 = vpack.c.bf16 %v2955_v42, %v2955_v42  ;;  %v6288_v42 = vld [vmem:[#allocation13_spill] sm:$0xff] }
 0x3c0   :  { %v2842_v11 = vor.u32 %v2840_v0, %v2838_v12  ;;  %v2979_v53 = vrot.slane %v2977_v34, 1  ;;  %v2982_v36 = vrot.slane %v2980_v43, 2  ;;  %v3106_v23 = vmul.f32 %v5810_v25, %v5663_v28  ;;  %v4872_v28 = vld [vmem:[%s6250_s7 + $0x80] sm:$0xff]  }
 0x3c1   :  { %v5941_v57 = vsel %vm1363_vm9, %v2834_v21, %v2838_v12  ;;  %v2987_v16 = vrot.slane %v2985_v52, 1  ;;  %v2990_v27 = vrot.slane %v2988_v10, 2  ;;  %v2994_v58 = vshrl.u32 %v2958_v47, 16 }
 0x3c2   :  { %4491 = vmatpush3.bf16.msra.mxu0 %v4870_v40  ;;  %v5944_v37 = vsel %vm1363_vm9, %v2842_v11, %v2846_v8  ;;  %v2983_v30 = vor.u32 %v2982_v36, %v2979_v53  ;;  %v2997_v17 = vshll.u32 %v2958_v47, 16  ;;  %v3107_v63 = vmul.f32 %v5812_v32, %v6281_v7  ;;  %v4874_v47 = vld [vmem:[%s6250_s7 + $0x90] sm:$0xff]  }
 0x3c3   :  { %4492 = vmatprep.subr.bf16.mxu0 %v4871_v38  ;;  %v2991_v19 = vor.u32 %v2990_v27, %v2987_v16  ;;  %v2996_v5 = vrot.slane %v2994_v58, 1  ;;  %v3108_v14 = vmul.f32 %v5814_v54, %v6282_v26  ;;  %v3110_v22 = vpack.c.bf16 %v3106_v23, %v3105_v13  ;;  %v4879_v26 = vld [vmem:[%s6250_s7 + $0xb8] sm:$0xff]  }
 0x3c4   :  { %v2999_v35 = vrot.slane %v2997_v17, 2  ;;  %v3109_v29 = vmul.f32 %v5808_v56, %v6283_v51  ;;  %v3241_v44 = vmul.f32 %v5808_v56, %v6284_v31  ;;  %v3242_v45 = vmul.f32 %v5810_v25, %v6285_v62  ;;  %v4873_v25 = vld [vmem:[%s6250_s7 + $0x88] sm:$0xff]   ;;  %v4883_v51 = vld [vmem:[%s6250_s7 + $0xd8] sm:$0xff]  }
 0x3c5   :  { %v5960_v40 = vsel %vm651_vm3, %v2983_v30, %v2991_v19  ;;  %v3111_v3 = vpack.c.bf16 %v3108_v14, %v3107_v63  ;;  %v3133_v50 = vrot.slane %v3110_v22, 2  ;;  %v3243_v33 = vmul.f32 %v5812_v32, %v6286_v41  ;;  %v4875_v30 = vld [vmem:[%s6250_s7 + $0x98] sm:$0xff]   ;;  %v4880_v14 = vld [vmem:[%s6250_s7 + $0xc0] sm:$0xff]   ;;  %v4881_v22 = vld [vmem:[%s6250_s7 + $0xc8] sm:$0xff]  }
 0x3c6   :  { %4493 = vmatpush3.bf16.msra.mxu0 %v4871_v38  ;;  %v3000_v55 = vor.u32 %v2999_v35, %v2996_v5  ;;  %v3112_v0 = vpack.c.bf16 %v3109_v29, %v3109_v29  ;;  %v3244_v6 = vmul.f32 %v5814_v54, %v6287_v15  ;;  %v3246_v24 = vpack.c.bf16 %v3242_v45, %v3241_v44  ;;  %v4878_v5 = vld [vmem:[%s6250_s7 + $0xb0] sm:$0xff]   ;;  %v4887_v31 = vld [vmem:[%s6250_s7 + $0xf8] sm:$0xff]   ;;  %v4888_v44 = vld [vmem:[%s6250_s7 + $0x100] sm:$0xff]  }
 0x3c7   :  { %4498 = vmatprep.subr.bf16.mxu0 %v4872_v28  ;;  %v3134_v61 = vrot.slane %v3111_v3, 2  ;;  %v3245_v13 = vmul.f32 %v5808_v56, %v6288_v42  ;;  %v4882_v35 = vld [vmem:[%s6250_s7 + $0xd0] sm:$0xff]   ;;  %v4889_v62 = vld [vmem:[%s6250_s7 + $0x108] sm:$0xff]   ;;  %v4891_v3 = vld [vmem:[%s6250_s7 + $0x118] sm:$0xff]  }
 0x3c8   :  { %v5972_v12 = vsel %vm651_vm3, %v2991_v19, %v3000_v55  ;;  %v3136_v32 = vrot.slane %v3112_v0, 2  ;;  %v3247_v8 = vpack.c.bf16 %v3244_v6, %v3243_v33  ;;  %v3267_v34 = vshrl.u32 %v3246_v24, 16  ;;  %v4877_v19 = vld [vmem:[%s6250_s7 + $0xa8] sm:$0xff]   ;;  %v4886_v29 = vld [vmem:[%s6250_s7 + $0xf0] sm:$0xff]   ;;  %v4899_v55 = vld [vmem:[%s6250_s7 + $0x158] sm:$0xff]  }
 0x3c9   :  { %4495 = vmatmul.mubr.bf16.vlgmr.msra.gmra.mrb[16].mxu0 %v5863_v9  ;;  %v5976_v54 = vsel %vm546_vm2, %v3133_v50, %v3134_v61  ;;  %v3270_v43 = vshll.u32 %v3246_v24, 16  ;;  %v3248_v38 = vpack.c.bf16 %v3245_v13, %v3245_v13  ;;  %v4890_v45 = vld [vmem:[%s6250_s7 + $0x110] sm:$0xff]   ;;  %v4896_v50 = vld [vmem:[%s6250_s7 + $0x140] sm:$0xff]   ;;  %v4897_v41 = vld [vmem:[%s6250_s7 + $0x148] sm:$0xff]  }
 0x3ca   :  { %4499 = vmatpush3.bf16.msra.mxu0 %v4872_v28  ;;  %4514 = vmatprep.mubr.bf16.mxu0 %v5884_v59  ;;  %v5980_v21 = vsel %vm546_vm2, %v3134_v61, %v3136_v32  ;;  %v3269_v56 = vrot.slane %v3267_v34, 2  ;;  %v3275_v52 = vshrl.u32 %v3247_v8, 16  ;;  %v3278_v10 = vshll.u32 %v3247_v8, 16  ;;  %v4876_v28 = vld [vmem:[%s6250_s7 + $0xa0] sm:$0xff]   ;;  %v4898_v33 = vld [vmem:[%s6250_s7 + $0x150] sm:$0xff]   ;;  %v4905_v15 = vld [vmem:[%s6250_s7 + $0x188] sm:$0xff]  }
 0x3cb   :  { %4500 = vmatprep.subr.bf16.mxu0 %v4873_v25  ;;  %v3272_v9 = vrot.slane %v3270_v43, 3  ;;  %v3284_v11 = vshrl.u32 %v3248_v38, 16  ;;  %v3287_v53 = vshll.u32 %v3248_v38, 16  ;;  %v4904_v0 = vld [vmem:[%s6250_s7 + $0x180] sm:$0xff]   ;;  %v4906_v6 = vld [vmem:[%s6250_s7 + $0x190] sm:$0xff]   ;;  %v4907_v24 = vld [vmem:[%s6250_s7 + $0x198] sm:$0xff]  }
 0x3cc   :  { %v3277_v36 = vrot.slane %v3275_v52, 2  ;;  %v3280_v23 = vrot.slane %v3278_v10, 3  ;;  %v4911_v61 = vld [vmem:[%s6250_s7 + $0x1b8] sm:$0xff]   ;;  %v4912_v42 = vld [vmem:[%s6250_s7 + $0x1c0] sm:$0xff]   ;;  %v4913_v13 = vld [vmem:[%s6250_s7 + $0x1c8] sm:$0xff]  }
 0x3cd   :  { %v3273_v16 = vor.u32 %v3272_v9, %v3269_v56  ;;  %v3286_v27 = vrot.slane %v3284_v11, 2  ;;  %v3289_v58 = vrot.slane %v3287_v53, 3  ;;  %v4914_v32 = vld [vmem:[%s6250_s7 + $0x1d0] sm:$0xff]   ;;  %v4915_v8 = vld [vmem:[%s6250_s7 + $0x1d8] sm:$0xff]   ;;  %v4917_v34 = vld [vmem:[%s6250_s7 + $0x1e8] sm:$0xff]  }
 0x3ce   :  { %4501 = vmatpush3.bf16.msra.mxu0 %v4873_v25  ;;  %v3281_v59 = vor.u32 %v3280_v23, %v3277_v36  ;;  %v4910_v25 = vld [vmem:[%s6250_s7 + $0x1b0] sm:$0xff]   ;;  %v4919_v43 = vld [vmem:[%s6250_s7 + $0x1f8] sm:$0xff]   ;;  %v4920_v38 = vld [vmem:[%s6250_s7 + $0x200] sm:$0xff]  }
 0x3cf   :  { %4502 = vmatprep.subr.bf16.mxu0 %v4874_v47  ;;  %v3290_v17 = vor.u32 %v3289_v58, %v3286_v27  ;;  %v4921_v56 = vld [vmem:[%s6250_s7 + $0x208] sm:$0xff]   ;;  %v4922_v52 = vld [vmem:[%s6250_s7 + $0x210] sm:$0xff]   ;;  %v4923_v10 = vld [vmem:[%s6250_s7 + $0x218] sm:$0xff]  }
 0x3d0   :  { %v5989_v7 = vsel %vm836_vm5, %v3273_v16, %v3281_v59  ;;  %v4926_v9 = vld [vmem:[%s6250_s7 + $0x230] sm:$0xff]   ;;  %v4927_v11 = vld [vmem:[%s6250_s7 + $0x238] sm:$0xff]   ;;  %v3476_v53 = vld [vmem:[%s6254_s11] sm:$0xff]  ;;  %v4959_v16 = vmov 0.0|0.0  }
 0x3d1   :  { %v5992_v63 = vsel %vm836_vm5, %v3281_v59, %v3290_v17  ;;  %v3477_v36 = vld [vmem:[%s6254_s11 + $0x8] sm:$0xff]  ;;  %v3478_v23 = vld [vmem:[%s6254_s11 + $0x10] sm:$0xff]  ;;  %4673 = vmatprep.subr.bf16.mxu1 %v4959_v16  ;;  %v3479_v58 = vld [vmem:[%s6254_s11 + $0x18] sm:$0xff]  ;;  %v4961_v59 = vmov 0.0  }
 0x3d2   :  { %4503 = vmatpush3.bf16.msra.mxu0 %v4874_v47  ;;  %v4925_v47 = vld [vmem:[%s6250_s7 + $0x228] sm:$0xff]   ;;  %v4674_v27 = vpack.c.bf16 %v3477_v36, %v3476_v53  ;;  %4670 = vmatprep.mubr.msk.f32.mxu1 %vm4960_vm10, %v4961_v59  ;;  %v3480_v17 = vld [vmem:[%s6254_s11 + $0x20] sm:$0xff] }
 0x3d3   :  { %4504 = vmatprep.subr.bf16.mxu0 %v4875_v30 }
 0x3d4   :  { %4675 = vmatpush3.bf16.msra.mxu1 %v4674_v27 }
 0x3d5   :  { %4676 = vmatprep.subr.bf16.mxu1 %v4959_v16 }
 0x3d6   :  { %4505 = vmatpush3.bf16.msra.mxu0 %v4875_v30  ;;  %v4677_v30 = vpack.c.bf16 %v3479_v58, %v3478_v23 }
 0x3d7   :  { %4506 = vmatprep.subr.bf16.mxu0 %v4876_v28 }
 0x3d8   :  { %4678 = vmatpush3.bf16.msra.mxu1 %v4677_v30 }
 0x3d9   :  { %4679 = vmatprep.subr.bf16.mxu1 %v4959_v16 }
 0x3da   :  { %4507 = vmatpush3.bf16.msra.mxu0 %v4876_v28  ;;  %v3482_v28 = vld [vmem:[%s6254_s11 + $0x30] sm:$0xff] }
 0x3db   :  { %4508 = vmatprep.subr.bf16.mxu0 %v4877_v19 }
 0x3de   :  { %4509 = vmatpush3.bf16.msra.mxu0 %v4877_v19  ;;  %v3483_v19 = vld [vmem:[%s6254_s11 + $0x38] sm:$0xff] }
 0x3df   :  { %4510 = vmatprep.subr.bf16.mxu0 %v4878_v5 }
 0x3e2   :  { %4511 = vmatpush3.bf16.msra.mxu0 %v4878_v5  ;;  %v4683_v5 = vpack.c.bf16 %v3483_v19, %v3482_v28  ;;  %v6289_v19 = vld [vmem:[#allocation8_spill] sm:$0xff] }
 0x3e3   :  { %4512 = vmatprep.subr.bf16.mxu0 %v4879_v26 }
 0x3e6   :  { %4513 = vmatpush3.bf16.msra.mxu0 %v4879_v26  ;;  %v3484_v26 = vld [vmem:[%s6254_s11 + $0x40] sm:$0xff] }
 0x3e7   :  { %4518 = vmatprep.subr.bf16.mxu0 %v4880_v14 }
 0x3e9   :  { %4515 = vmatmul.mubr.bf16.vlgmr.msra.gmra.mrb[16].mxu0 %v5887_v49  ;;  %v4884_v49 = vld [vmem:[%s6250_s7 + $0xe0] sm:$0xff]  }
 0x3ea   :  { %4519 = vmatpush3.bf16.msra.mxu0 %v4880_v14  ;;  %4534 = vmatprep.mubr.bf16.mxu0 %v5913_v1  ;;  %v4885_v1 = vld [vmem:[%s6250_s7 + $0xe8] sm:$0xff]  }
 0x3eb   :  { %4520 = vmatprep.subr.bf16.mxu0 %v4881_v22  ;;  %v3485_v14 = vld [vmem:[%s6254_s11 + $0x48] sm:$0xff] }
 0x3ee   :  { %4521 = vmatpush3.bf16.msra.mxu0 %v4881_v22  ;;  %v4686_v22 = vpack.c.bf16 %v3485_v14, %v3484_v26  ;;  %v6290_v26 = vld [vmem:[#allocation5_spill] sm:$0xff] }
 0x3ef   :  { %4522 = vmatprep.subr.bf16.mxu0 %v4882_v35 }
 0x3f2   :  { %4523 = vmatpush3.bf16.msra.mxu0 %v4882_v35  ;;  %v3486_v35 = vld [vmem:[%s6254_s11 + $0x50] sm:$0xff] }
 0x3f3   :  { %4524 = vmatprep.subr.bf16.mxu0 %v4883_v51 }
 0x3f6   :  { %4525 = vmatpush3.bf16.msra.mxu0 %v4883_v51  ;;  %v3487_v51 = vld [vmem:[%s6254_s11 + $0x58] sm:$0xff] }
 0x3f7   :  { %4526 = vmatprep.subr.bf16.mxu0 %v4884_v49 }
 0x3fa   :  { %4527 = vmatpush3.bf16.msra.mxu0 %v4884_v49  ;;  %v4689_v49 = vpack.c.bf16 %v3487_v51, %v3486_v35  ;;  %v6292_v51 = vld [vmem:[#allocation6_spill] sm:$0xff] }
 0x3fb   :  { %4528 = vmatprep.subr.bf16.mxu0 %v4885_v1 }
 0x3fe   :  { %4529 = vmatpush3.bf16.msra.mxu0 %v4885_v1  ;;  %v3488_v1 = vld [vmem:[%s6254_s11 + $0x60] sm:$0xff] }
 0x3ff   :  { %4530 = vmatprep.subr.bf16.mxu0 %v4886_v29 }
 0x402   :  { %4531 = vmatpush3.bf16.msra.mxu0 %v4886_v29  ;;  %v3489_v29 = vld [vmem:[%s6254_s11 + $0x68] sm:$0xff] }
 0x403   :  { %4532 = vmatprep.subr.bf16.mxu0 %v4887_v31 }
 0x406   :  { %4533 = vmatpush3.bf16.msra.mxu0 %v4887_v31  ;;  %v4692_v31 = vpack.c.bf16 %v3489_v29, %v3488_v1 }
 0x407   :  { %4538 = vmatprep.subr.bf16.mxu0 %v4888_v44 }
 0x409   :  { %4535 = vmatmul.mubr.bf16.vlgmr.msra.gmra.mrb[16].mxu0 %v5920_v46  ;;  %v4892_v46 = vld [vmem:[%s6250_s7 + $0x120] sm:$0xff]  }
 0x40a   :  { %4539 = vmatpush3.bf16.msra.mxu0 %v4888_v44  ;;  %4554 = vmatprep.mubr.bf16.mxu0 %v2683_v4  ;;  %v4895_v4 = vld [vmem:[%s6250_s7 + $0x138] sm:$0xff]   ;;  %v3490_v44 = vld [vmem:[%s6254_s11 + $0x70] sm:$0xff] }
 0x40b   :  { %4540 = vmatprep.subr.bf16.mxu0 %v4889_v62 }
 0x40e   :  { %4541 = vmatpush3.bf16.msra.mxu0 %v4889_v62  ;;  %v3491_v62 = vld [vmem:[%s6254_s11 + $0x78] sm:$0xff] }
 0x40f   :  { %4542 = vmatprep.subr.bf16.mxu0 %v4890_v45 }
 0x412   :  { %4543 = vmatpush3.bf16.msra.mxu0 %v4890_v45  ;;  %v4695_v45 = vpack.c.bf16 %v3491_v62, %v3490_v44 }
 0x413   :  { %4544 = vmatprep.subr.bf16.mxu0 %v4891_v3 }
 0x416   :  { %4545 = vmatpush3.bf16.msra.mxu0 %v4891_v3 }
 0x417   :  { %4546 = vmatprep.subr.bf16.mxu0 %v4892_v46 }
 0x41a   :  { %4547 = vmatpush3.bf16.msra.mxu0 %v4892_v46 }
 0x41b   :  { %4548 = vmatprep.subr.bf16.mxu0 %v4893_v20 }
 0x41e   :  { %4549 = vmatpush3.bf16.msra.mxu0 %v4893_v20 }
 0x41f   :  { %4550 = vmatprep.subr.bf16.mxu0 %v4894_v2 }
 0x422   :  { %4551 = vmatpush3.bf16.msra.mxu0 %v4894_v2 }
 0x423   :  { %4552 = vmatprep.subr.bf16.mxu0 %v4895_v4 }
 0x426   :  { %4553 = vmatpush3.bf16.msra.mxu0 %v4895_v4 }
 0x427   :  { %4558 = vmatprep.subr.bf16.mxu0 %v4896_v50 }
 0x429   :  { %4555 = vmatmul.mubr.bf16.vlgmr.msra.gmra.mrb[16].mxu0 %v2684_v18  ;;  %v4902_v18 = vld [vmem:[%s6250_s7 + $0x170] sm:$0xff]  }
 0x42a   :  { %4559 = vmatpush3.bf16.msra.mxu0 %v4896_v50  ;;  %4574 = vmatprep.mubr.bf16.mxu0 %v5941_v57  ;;  %v4903_v57 = vld [vmem:[%s6250_s7 + $0x178] sm:$0xff]  }
 0x42b   :  { %4560 = vmatprep.subr.bf16.mxu0 %v4897_v41 }
 0x42e   :  { %4561 = vmatpush3.bf16.msra.mxu0 %v4897_v41 }
 0x42f   :  { %4562 = vmatprep.subr.bf16.mxu0 %v4898_v33 }
 0x432   :  { %4563 = vmatpush3.bf16.msra.mxu0 %v4898_v33 }
 0x433   :  { %4564 = vmatprep.subr.bf16.mxu0 %v4899_v55 }
 0x436   :  { %4565 = vmatpush3.bf16.msra.mxu0 %v4899_v55 }
 0x437   :  { %4566 = vmatprep.subr.bf16.mxu0 %v4900_v60 }
 0x43a   :  { %4567 = vmatpush3.bf16.msra.mxu0 %v4900_v60 }
 0x43b   :  { %4568 = vmatprep.subr.bf16.mxu0 %v4901_v39 }
 0x43e   :  { %4569 = vmatpush3.bf16.msra.mxu0 %v4901_v39 }
 0x43f   :  { %4570 = vmatprep.subr.bf16.mxu0 %v4902_v18 }
 0x442   :  { %4571 = vmatpush3.bf16.msra.mxu0 %v4902_v18 }
 0x443   :  { %4572 = vmatprep.subr.bf16.mxu0 %v4903_v57 }
 0x446   :  { %4573 = vmatpush3.bf16.msra.mxu0 %v4903_v57 }
 0x447   :  { %4578 = vmatprep.subr.bf16.mxu0 %v4904_v0 }
 0x449   :  { %4575 = vmatmul.mubr.bf16.vlgmr.msra.gmra.mrb[16].mxu0 %v5944_v37  ;;  %v4908_v37 = vld [vmem:[%s6250_s7 + $0x1a0] sm:$0xff]  }
 0x44a   :  { %4579 = vmatpush3.bf16.msra.mxu0 %v4904_v0  ;;  %4594 = vmatprep.mubr.bf16.mxu0 %v5960_v40  ;;  %v4909_v40 = vld [vmem:[%s6250_s7 + $0x1a8] sm:$0xff]  }
 0x44b   :  { %4580 = vmatprep.subr.bf16.mxu0 %v4905_v15 }
 0x44e   :  { %4581 = vmatpush3.bf16.msra.mxu0 %v4905_v15 }
 0x44f   :  { %4582 = vmatprep.subr.bf16.mxu0 %v4906_v6 }
 0x452   :  { %4583 = vmatpush3.bf16.msra.mxu0 %v4906_v6 }
 0x453   :  { %4584 = vmatprep.subr.bf16.mxu0 %v4907_v24 }
 0x456   :  { %4585 = vmatpush3.bf16.msra.mxu0 %v4907_v24 }
 0x457   :  { %4586 = vmatprep.subr.bf16.mxu0 %v4908_v37 }
 0x45a   :  { %4587 = vmatpush3.bf16.msra.mxu0 %v4908_v37 }
 0x45b   :  { %4588 = vmatprep.subr.bf16.mxu0 %v4909_v40 }
 0x45e   :  { %4589 = vmatpush3.bf16.msra.mxu0 %v4909_v40 }
 0x45f   :  { %4590 = vmatprep.subr.bf16.mxu0 %v4910_v25 }
 0x462   :  { %4591 = vmatpush3.bf16.msra.mxu0 %v4910_v25 }
 0x463   :  { %4592 = vmatprep.subr.bf16.mxu0 %v4911_v61 }
 0x466   :  { %4593 = vmatpush3.bf16.msra.mxu0 %v4911_v61 }
 0x467   :  { %4598 = vmatprep.subr.bf16.mxu0 %v4912_v42 }
 0x469   :  { %4595 = vmatmul.mubr.bf16.vlgmr.msra.gmra.mrb[16].mxu0 %v5972_v12  ;;  %v4916_v12 = vld [vmem:[%s6250_s7 + $0x1e0] sm:$0xff]  }
 0x46a   :  { %4599 = vmatpush3.bf16.msra.mxu0 %v4912_v42  ;;  %4614 = vmatprep.mubr.bf16.mxu0 %v5976_v54  ;;  %v4918_v54 = vld [vmem:[%s6250_s7 + $0x1f0] sm:$0xff]  }
 0x46b   :  { %4600 = vmatprep.subr.bf16.mxu0 %v4913_v13 }
 0x46e   :  { %4601 = vmatpush3.bf16.msra.mxu0 %v4913_v13 }
 0x46f   :  { %4602 = vmatprep.subr.bf16.mxu0 %v4914_v32 }
 0x472   :  { %4603 = vmatpush3.bf16.msra.mxu0 %v4914_v32 }
 0x473   :  { %4604 = vmatprep.subr.bf16.mxu0 %v4915_v8 }
 0x476   :  { %4605 = vmatpush3.bf16.msra.mxu0 %v4915_v8 }
 0x477   :  { %4606 = vmatprep.subr.bf16.mxu0 %v4916_v12 }
 0x47a   :  { %4607 = vmatpush3.bf16.msra.mxu0 %v4916_v12 }
 0x47b   :  { %4608 = vmatprep.subr.bf16.mxu0 %v4917_v34 }
 0x47e   :  { %4609 = vmatpush3.bf16.msra.mxu0 %v4917_v34 }
 0x47f   :  { %4610 = vmatprep.subr.bf16.mxu0 %v4918_v54 }
 0x482   :  { %4611 = vmatpush3.bf16.msra.mxu0 %v4918_v54 }
 0x483   :  { %4612 = vmatprep.subr.bf16.mxu0 %v4919_v43 }
 0x486   :  { %4613 = vmatpush3.bf16.msra.mxu0 %v4919_v43 }
 0x487   :  { %4618 = vmatprep.subr.bf16.mxu0 %v4920_v38 }
 0x489   :  { %4615 = vmatmul.mubr.bf16.vlgmr.msra.gmra.mrb[16].mxu0 %v5980_v21  ;;  %v4924_v21 = vld [vmem:[%s6250_s7 + $0x220] sm:$0xff]  }
 0x48a   :  { %4619 = vmatpush3.bf16.msra.mxu0 %v4920_v38  ;;  %4634 = vmatprep.mubr.bf16.mxu0 %v5989_v7  ;;  %v3481_v7 = vld [vmem:[%s6254_s11 + $0x28] sm:$0xff] }
 0x48b   :  { %4620 = vmatprep.subr.bf16.mxu0 %v4921_v56 }
 0x48e   :  { %4621 = vmatpush3.bf16.msra.mxu0 %v4921_v56 }
 0x48f   :  { %4622 = vmatprep.subr.bf16.mxu0 %v4922_v52 }
 0x492   :  { %4623 = vmatpush3.bf16.msra.mxu0 %v4922_v52 }
 0x493   :  { %4624 = vmatprep.subr.bf16.mxu0 %v4923_v10 }
 0x496   :  { %4625 = vmatpush3.bf16.msra.mxu0 %v4923_v10 }
 0x497   :  { %4626 = vmatprep.subr.bf16.mxu0 %v4924_v21 }
 0x49a   :  { %4627 = vmatpush3.bf16.msra.mxu0 %v4924_v21  ;;  %v3395_v21 = vld [vmem:[%s6251_s8] sm:$0x1] }
 0x49b   :  { %4628 = vmatprep.subr.bf16.mxu0 %v4925_v47 }
 0x49e   :  { %4629 = vmatpush3.bf16.msra.mxu0 %v4925_v47 }
 0x49f   :  { %4630 = vmatprep.subr.bf16.mxu0 %v4926_v9 }
 0x4a2   :  { %4631 = vmatpush3.bf16.msra.mxu0 %v4926_v9 }
 0x4a3   :  { %4632 = vmatprep.subr.bf16.mxu0 %v4927_v11 }
 0x4a6   :  { %4633 = vmatpush3.bf16.msra.mxu0 %v4927_v11  ;;  %v3396_v11 = vld [vmem:[%s6252_s9] sm:$0x1] }
 0x4a9   :  { %4635 = vmatmul.mubr.bf16.vlgmr.msra.gmra.mrb[16].mxu0 %v5992_v63  ;;  %v4680_v63 = vpack.c.bf16 %v3481_v7, %v3480_v17 }
 0x4ab   :  { %4681 = vmatpush3.bf16.msra.mxu1 %v4680_v63 }
 0x4ac   :  { %4682 = vmatprep.subr.bf16.mxu1 %v4959_v16 }
 0x4af   :  { %4684 = vmatpush3.bf16.msra.mxu1 %v4683_v5 }
 0x4b0   :  { %4685 = vmatprep.subr.bf16.mxu1 %v4959_v16 }
 0x4b3   :  { %4687 = vmatpush3.bf16.msra.mxu1 %v4686_v22  ;;  %v6291_v22 = vld [vmem:[#allocation7_spill] sm:$0xff] }
 0x4b4   :  { %4688 = vmatprep.subr.bf16.mxu1 %v4959_v16 }
 0x4b7   :  { %4690 = vmatpush3.bf16.msra.mxu1 %v4689_v49 }
 0x4b8   :  { %4691 = vmatprep.subr.bf16.mxu1 %v4959_v16 }
 0x4bb   :  { %4693 = vmatpush3.bf16.msra.mxu1 %v4692_v31 }
 0x4bc   :  { %4694 = vmatprep.subr.bf16.mxu1 %v4959_v16 }
 0x4bf   :  { %4696 = vmatpush3.bf16.msra.mxu1 %v4695_v45 }
 0x57c   :  { %v4636_v3 = vpop.f32.mrb[16].mxu0 }
 0x57d   :  { %v3376_v46 = vpop.f32.mrb[17].mxu0 }
 0x57e   :  { %v4637_v20 = vpop.f32.mrb[18].mxu0 }
 0x57f   :  { %v3379_v2 = vpop.f32.mrb[19].mxu0 }
 0x580   :  { %v3397_v4 = vadd.f32 %v3379_v2, %v3376_v46 }
 0x582   :  { %v3398_v50 = vadd.f32 %v4636_v3, %v3397_v4 }
 0x584   :  { %v3399_v41 = vadd.f32 %v4637_v20, %v3398_v50 }
 0x586   :  { %v3400_v33 = vrot.slane %v3399_v41, 4 }
 0x588   :  { %v3401_v55 = vadd.f32 %v3400_v33, %v3399_v41 }
 0x58a   :  { %v3402_v60 = vrot.slane %v3401_v55, 2 }
 0x58c   :  { %v3403_v39 = vadd.f32 %v3402_v60, %v3401_v55 }
 0x58e   :  { %v3404_v18 = vrot.slane %v3403_v39, 1 }
 0x590   :  { %v3405_v57 = vadd.f32 %v3404_v18, %v3403_v39 }
 0x592   :  { %v3406_v0 = vmul.f32 0.03125, %v3405_v57 }
 0x594   :  { %v3407_v15 = vsub.f32 %v3376_v46, %v3406_v0  ;;  %v3408_v6 = vsub.f32 %v3379_v2, %v3406_v0  ;;  %v3409_v24 = vsub.f32 %v4636_v3, %v3406_v0  ;;  %v3410_v37 = vsub.f32 %v4637_v20, %v3406_v0 }
 0x596   :  { %v3411_v40 = vmul.f32 %v3407_v15, %v3407_v15  ;;  %v3412_v25 = vmul.f32 %v3408_v6, %v3408_v6  ;;  %v3413_v61 = vmul.f32 %v3409_v24, %v3409_v24  ;;  %v3414_v13 = vmul.f32 %v3410_v37, %v3410_v37  ;;  %v4032_v15 = vld [vmem:[%s6255_s12] ss:$0 sm:$0xff] }
 0x598   :  { %v3415_v42 = vadd.f32 %v3412_v25, %v3411_v40 }
 0x59a   :  { %v3416_v32 = vadd.f32 %v3415_v42, %v3413_v61 }
 0x59c   :  { %v3417_v8 = vadd.f32 %v3416_v32, %v3414_v13 }
 0x59e   :  { %v3418_v12 = vrot.slane %v3417_v8, 4 }
 0x5a0   :  { %v3419_v34 = vadd.f32 %v3418_v12, %v3417_v8 }
 0x5a2   :  { %v3420_v54 = vrot.slane %v3419_v34, 2 }
 0x5a4   :  { %v3421_v43 = vadd.f32 %v3420_v54, %v3419_v34 }
 0x5a6   :  { %v3422_v38 = vrot.slane %v3421_v43, 1 }
 0x5a8   :  { %v3423_v56 = vadd.f32 %v3422_v38, %v3421_v43 }
 0x5aa   :  { %v3424_v52 = vmul.f32 0.03125, %v3423_v56 }
 0x5ac   :  { %v3425_v10 = vadd.f32 1e-05, %v3424_v52 }
 0x5ae   :  { %4932 = vrsqrt.f32 %v3425_v10 }
 0x5b8   :  { %v4933_v47 = vpop.eup %4932 }
 0x5b9   :  { %v3427_v9 = vmul.f32 %v4933_v47, %v3395_v21 }
 0x5bb   :  { %v3428_v53 = vmul.f32 %v3427_v9, %v3406_v0  ;;  %v3434_v36 = vrot.slane %v3427_v9, %v5304_v48 }
 0x5bd   :  { %v3429_v23 = vsub.f32 %v3396_v11, %v3428_v53  ;;  %v3436_v16 = vmul.f32 %v3434_v36, %v3376_v46  ;;  %v3437_v27 = vmul.f32 %v3434_v36, %v3379_v2  ;;  %v3438_v58 = vmul.f32 %v4636_v3, %v3434_v36 }
 0x5be   :  { %v3439_v59 = vmul.f32 %v4637_v20, %v3434_v36 }
 0x5bf   :  { %v3444_v30 = vrot.slane %v3429_v23, %v5304_v48 }
 0x5c1   :  { %v3446_v17 = vadd.f32 %v3444_v30, %v3436_v16  ;;  %v3447_v7 = vadd.f32 %v3444_v30, %v3437_v27  ;;  %v3448_v63 = vadd.f32 %v3444_v30, %v3438_v58  ;;  %v3449_v28 = vadd.f32 %v3444_v30, %v3439_v59 }
 0x5c3   :  { %v3450_v5 = vadd.f32 %v3446_v17, %v6289_v19  ;;  %v3451_v14 = vadd.f32 %v3447_v7, %v6290_v26  ;;  %v3452_v35 = vadd.f32 %v3448_v63, %v6291_v22  ;;  %v3453_v49 = vadd.f32 %v3449_v28, %v6292_v51 }
 0x5c5   :  { %v3454_v1 = vmax.f32 %v3450_v5, 0.0  ;;  %v3455_v29 = vmax.f32 %v3451_v14, 0.0  ;;  %v3456_v31 = vmax.f32 %v3452_v35, 0.0  ;;  %v3457_v44 = vmax.f32 %v3453_v49, 0.0 }
 0x5c7   :  { %v3458_v62 = vadd.f32 %v3455_v29, %v3454_v1  ;;  %v3467_v45 = vadd.f32 %v3457_v44, %v3456_v31 }
 0x5c9   :  { %v3459_v3 = vrot.slane %v3458_v62, 4  ;;  %v3468_v48 = vrot.slane %v3467_v45, 4 }
 0x5cb   :  { %v3460_v46 = vadd.f32 %v3459_v3, %v3458_v62  ;;  %v3469_v20 = vadd.f32 %v3468_v48, %v3467_v45 }
 0x5cd   :  { %v3461_v2 = vrot.slane %v3460_v46, 2  ;;  %v3470_v4 = vrot.slane %v3469_v20, 2 }
 0x5cf   :  { %v3462_v50 = vadd.f32 %v3461_v2, %v3460_v46  ;;  %v3471_v41 = vadd.f32 %v3470_v4, %v3469_v20 }
 0x5d1   :  { %v3463_v33 = vrot.slane %v3462_v50, 1  ;;  %v3472_v55 = vrot.slane %v3471_v41, 1 }
 0x5d3   :  { %v3464_v60 = vadd.f32 %v3463_v33, %v3462_v50  ;;  %v3473_v39 = vadd.f32 %v3472_v55, %v3471_v41 }
 0x5d5   :  { %v3466_v18 = vmul.f32 0.0625, %v3464_v60  ;;  %v3474_v57 = vmul.f32 0.0625, %v3473_v39 }
 0x5d7   :  { %v3475_v0 = vsel %vm1325_vm8, %v3466_v18, %v3474_v57 }
 0x5d8   :  { %4671 = vmatmul.mubr.f32.vlgmr.msra.gmra.mrb[4].mxu1 %v3475_v0 }
 0x6ab   :  { %v3565_v6 = vpop.f32.mrb[4].mxu1 }
 0x6ac   :  { %v3566_v24 = vadd.f32 %v4032_v15, %v3565_v6  ;;  %v4672_v37 = vpop.f32.mrb[5].mxu1 }
 0x6ae   :  { %3569 = vst [vmem:[#allocation2] sm:$0x3] %v3566_v24 }
 0x6af   :  { %4945 = shalt.err (!%p4942_p4)
}
 0x6b0   :  { %s4946_s10 = scalar_lea.hbm %s6256_s13, 32 }
 0x6b1   :  { %p4947_p5 = scmp.ne.s32.totalorder %s6256_s13, %s4946_s10  ;;  %p4950_p6 = scmp.lt.u32.totalorder %s4946_s10, %s6256_s13 }
 0x6b3   :  { %p4952_p7 = pnand %p4950_p6, %p4947_p5 }
 0x6b5   :  { %4955 = shalt.err (!%p4952_p7)
}
 0x6b6   :  { %3579 = dma.vmem_to_hbm [thread:$0]  %s3577_s2, 32, %s6256_s13, [#allocation3]  }
 0x6b7   :  { %4956 = dma.done.wait [#allocation3], 32  }
 0x6b8   :  { %4957 = vsyncadd [#allocation3], 4294967264 }
 0x6b9   :  { %3583 = vsyncpa [#allocation3], 1 }

</bundles_post_ra>
